<compile_context>
chip_gen: v6e
topology: v6e:2x2x1
jax: 0.10.0
libtpu: 0.0.40
codegen_flags: <defaults>
</compile_context>

<pallas_src>
import functools

import jax
import jax.numpy as jnp
from jax.experimental import pallas as pl
from jax.experimental.pallas import tpu as pltpu

C1 = 64      # conv1 output channels
COUT = 10    # conv2 output channels
COUTP = 16   # conv2 output channels padded (sublane-friendly)
K1P = 16     # conv1 contraction: 9 taps + 1 bias row, padded to 16


def _round_up(n, m):
    return -(-n // m) * m


def _edge_conv_kernel(xpad_ref, w1t_ref, w2t_ref, b2_ref, o_ref, h1_ref, *,
                      H, W, pad):
    """Fused conv1(1->64,3x3)+ReLU -> conv2(64->10,3x3)+ReLU, channels-major."""
    N = H * W

    # Lane masks for the horizontal (kw) taps, derived from an iota (no DMA'd
    # mask input).  `col` is the image column of each flattened pixel.
    q = jax.lax.broadcasted_iota(jnp.int32, (1, N), 1)
    if W & (W - 1) == 0:
        col = jnp.bitwise_and(q, W - 1)
    else:
        col = jax.lax.rem(q, W)  # TODO(synk): non-power-of-two W is untested.
    left_ok = col >= 1           # the kw=-1 neighbour exists
    right_ok = col < (W - 1)     # the kw=+1 neighbour exists

    # ---- conv1: build the (K1P, N) im2col in-register from lane-shifted
    # static slices of the zero-haloed flat input.  Row 9 is all-ones so the
    # conv1 bias (folded into w1t column 9) comes out of the same matmul.
    row_sel = jax.lax.broadcasted_iota(jnp.int32, (K1P, N), 0)
    p1 = jnp.zeros((K1P, N), jnp.float32)
    for k in range(9):
        kh, kw = divmod(k, 3)
        off = (kh - 1) * W + (kw - 1)
        piece = xpad_ref[:, pad + off:pad + off + N]          # (1, N) f32
        if kw == 0:
            piece = jnp.where(left_ok, piece, 0.0)
        elif kw == 2:
            piece = jnp.where(right_ok, piece, 0.0)
        p1 = jnp.where(row_sel == k, piece, p1)
    p1 = jnp.where(row_sel == 9, 1.0, p1).astype(jnp.bfloat16)

    h1 = jnp.dot(w1t_ref[...], p1, preferred_element_type=jnp.float32)
    h1 = jnp.maximum(h1, 0.0).astype(jnp.bfloat16)            # (C1, N), 1 cast

    # ---- stage the conv1 activation with zero column halos (halo-only
    # memset; the interior store is vreg/lane aligned).
    h1_ref[:, 0:pad] = jnp.zeros((C1, pad), jnp.bfloat16)
    h1_ref[:, pad + N:pad + N + pad] = jnp.zeros((C1, pad), jnp.bfloat16)
    h1_ref[:, pad:pad + N] = h1

    # ---- conv2: one matmul per horizontal tap (kw); the three vertical (kh)
    # bands are stacked on the contraction axis -> K = 3*C1 = 192.
    acc = None
    for kw in range(3):
        dc = kw - 1
        bands = [
            h1_ref[:, pad + (kh - 1) * W + dc:pad + (kh - 1) * W + dc + N]
            for kh in range(3)
        ]
        lhs = jnp.concatenate(bands, axis=0)                  # (3*C1, N) bf16
        if kw == 0:
            lhs = jnp.where(left_ok, lhs, 0)
        elif kw == 2:
            lhs = jnp.where(right_ok, lhs, 0)
        contrib = jnp.dot(w2t_ref[kw], lhs, preferred_element_type=jnp.float32)
        acc = contrib if acc is None else acc + contrib       # (COUTP, N) f32

    o_ref[...] = jnp.maximum(acc + b2_ref[...], 0.0)[:COUT, :]


def pack_params(params):
    """One-time repack of the HWIO weights for the kernel (call outside jit)."""
    w1 = params["w1"].reshape(9, C1).T                              # (C1, 9)
    w1t = jnp.concatenate(
        [w1, params["b1"].reshape(C1, 1),
         jnp.zeros((C1, K1P - 10), w1.dtype)], axis=1)              # (C1, 16)
    w2 = jnp.transpose(params["w2"], (1, 3, 0, 2)).reshape(3, COUT, 3 * C1)
    w2t = jnp.pad(w2, ((0, 0), (0, COUTP - COUT), (0, 0)))          # (3, 16, 192)
    b2 = jnp.pad(params["b2"], (0, COUTP - COUT)).reshape(COUTP, 1)
    return {"w1t": w1t.astype(jnp.bfloat16),
            "w2t": w2t.astype(jnp.bfloat16),
            "b2": b2.astype(jnp.float32)}


def edge_convolution_model(x, packed):
    """x: (H, W) float32 -> (10, H, W) float32 (matches the torch forward)."""
    H, W = x.shape
    N = H * W
    pad = _round_up(W + 1, 128)  # column halo; lane-aligns the staging store

    # Flattened input with zero column halos (the only XLA prologue op).
    x_pad = jnp.pad(x.astype(jnp.float32).reshape(1, N), ((0, 0), (pad, pad)))

    kernel = functools.partial(_edge_conv_kernel, H=H, W=W, pad=pad)
    out = pl.pallas_call(
        kernel,
        out_shape=jax.ShapeDtypeStruct((COUT, N), jnp.float32),
        in_specs=[pl.BlockSpec(memory_space=pltpu.MemorySpace.VMEM)] * 4,
        out_specs=pl.BlockSpec(memory_space=pltpu.MemorySpace.VMEM),
        scratch_shapes=[pltpu.VMEM((C1, N + 2 * pad), jnp.bfloat16)],
    )(x_pad, packed["w1t"], packed["w2t"], packed["b2"])

    # Output is already channels-major: reshape is free.
    return out.reshape(COUT, H, W)


def init_params(key):
    """Deterministic synthetic weights. Conv weights stored HWIO (3,3,Cin,Cout)."""
    k1, k2, k3, k4 = jax.random.split(key, 4)
    return {
        "w1": jax.random.normal(k1, (3, 3, 1, 64), jnp.float32) * 0.1,
        "b1": jax.random.normal(k2, (64,), jnp.float32) * 0.1,
        "w2": jax.random.normal(k3, (3, 3, 64, 10), jnp.float32) * 0.05,
        "b2": jax.random.normal(k4, (10,), jnp.float32) * 0.1,
    }


def _reference_model(x, params):
    """Pure-JAX f32 reference using lax.conv for a correctness check."""
    def conv(x_hwc, w, b):
        y = jax.lax.conv_general_dilated(
            x_hwc[None], w, window_strides=(1, 1), padding="SAME",
            dimension_numbers=("NHWC", "HWIO", "NHWC"))[0]
        return jax.nn.relu(y + b)
    h = conv(x[..., None], params["w1"], params["b1"])
    h = conv(h, params["w2"], params["b2"])
    return jnp.transpose(h, (2, 0, 1))


if __name__ == "__main__":
    key = jax.random.PRNGKey(0)
    kx, kp = jax.random.split(key)

    H, W = 16, 16
    x = jax.random.normal(kx, (H, W), jnp.float32)
    params = init_params(kp)
    packed = pack_params(params)           # one-time weight repack, outside jit

    fwd = jax.jit(edge_convolution_model)
    out = jax.block_until_ready(fwd(x, packed))

    assert out.shape == (10, H, W), out.shape
    assert out.dtype == jnp.float32

    ref = jax.block_until_ready(_reference_model(x, params))
    # bf16 matmul inputs (f32 accumulation) -> relaxed tolerance vs f32 ref.
    max_err = float(jnp.max(jnp.abs(out - ref)))
    assert jnp.allclose(out, ref, atol=3e-2, rtol=3e-2), max_err

    print("KERNEL_OK")
</pallas_src>

<mosaic_0001>
module attributes {stable_mosaic.version = 11 : i64} {
  func.func @_edge_conv_kernel(%arg0: memref<1x512xf32, #tpu.memory_space<vmem>>, %arg1: memref<64x16xbf16, #tpu.memory_space<vmem>>, %arg2: memref<3x16x192xbf16, #tpu.memory_space<vmem>>, %arg3: memref<16x1xf32, #tpu.memory_space<vmem>>, %arg4: memref<10x256xf32, #tpu.memory_space<vmem>>, %arg5: memref<64x512xbf16, #tpu.memory_space<vmem>>) attributes {dimension_semantics = [], scalar_prefetch = 0 : i64, scratch_operands = 1 : i64, tpu.core_type = #tpu.core_type<tc>} {
    %0 = tpu.iota {dimensions = array<i32: 1>} : vector<1x256xi32>
    %c15_i32 = arith.constant 15 : i32
    %1 = vector.broadcast %c15_i32 : i32 to vector<1x256xi32>
    %2 = arith.andi %0, %1 : vector<1x256xi32>
    %c1_i32 = arith.constant 1 : i32
    %3 = vector.broadcast %c1_i32 : i32 to vector<1x256xi32>
    %4 = arith.cmpi sge, %2, %3 : vector<1x256xi32>
    %c15_i32_0 = arith.constant 15 : i32
    %5 = vector.broadcast %c15_i32_0 : i32 to vector<1x256xi32>
    %6 = arith.cmpi slt, %2, %5 : vector<1x256xi32>
    %7 = tpu.iota {dimensions = array<i32: 0>} : vector<16x256xi32>
    %cst = arith.constant 0.000000e+00 : f32
    %8 = vector.broadcast %cst : f32 to vector<16x256xf32>
    %c0 = arith.constant 0 : index
    %c111 = arith.constant 111 : index
    %9 = vector.load %arg0[%c0, %c111] : memref<1x512xf32, #tpu.memory_space<vmem>>, vector<1x256xf32>
    %cst_1 = arith.constant 0.000000e+00 : f32
    %10 = vector.broadcast %cst_1 : f32 to vector<1x256xf32>
    %11 = arith.select %4, %9, %10 : vector<1x256xi1>, vector<1x256xf32>
    %c0_i32 = arith.constant 0 : i32
    %12 = vector.broadcast %c0_i32 : i32 to vector<16x256xi32>
    %13 = arith.cmpi eq, %7, %12 : vector<16x256xi32>
    %14 = vector.shape_cast %11 : vector<1x256xf32> to vector<1x256xf32>
    %15 = vector.broadcast %14 : vector<1x256xf32> to vector<16x256xf32>
    %16 = arith.select %13, %15, %8 : vector<16x256xi1>, vector<16x256xf32>
    %c0_2 = arith.constant 0 : index
    %c112 = arith.constant 112 : index
    %17 = vector.load %arg0[%c0_2, %c112] : memref<1x512xf32, #tpu.memory_space<vmem>>, vector<1x256xf32>
    %c1_i32_3 = arith.constant 1 : i32
    %18 = vector.broadcast %c1_i32_3 : i32 to vector<16x256xi32>
    %19 = arith.cmpi eq, %7, %18 : vector<16x256xi32>
    %20 = vector.shape_cast %17 : vector<1x256xf32> to vector<1x256xf32>
    %21 = vector.broadcast %20 : vector<1x256xf32> to vector<16x256xf32>
    %22 = arith.select %19, %21, %16 : vector<16x256xi1>, vector<16x256xf32>
    %c0_4 = arith.constant 0 : index
    %c113 = arith.constant 113 : index
    %23 = vector.load %arg0[%c0_4, %c113] : memref<1x512xf32, #tpu.memory_space<vmem>>, vector<1x256xf32>
    %cst_5 = arith.constant 0.000000e+00 : f32
    %24 = vector.broadcast %cst_5 : f32 to vector<1x256xf32>
    %25 = arith.select %6, %23, %24 : vector<1x256xi1>, vector<1x256xf32>
    %c2_i32 = arith.constant 2 : i32
    %26 = vector.broadcast %c2_i32 : i32 to vector<16x256xi32>
    %27 = arith.cmpi eq, %7, %26 : vector<16x256xi32>
    %28 = vector.shape_cast %25 : vector<1x256xf32> to vector<1x256xf32>
    %29 = vector.broadcast %28 : vector<1x256xf32> to vector<16x256xf32>
    %30 = arith.select %27, %29, %22 : vector<16x256xi1>, vector<16x256xf32>
    %c0_6 = arith.constant 0 : index
    %c127 = arith.constant 127 : index
    %31 = vector.load %arg0[%c0_6, %c127] : memref<1x512xf32, #tpu.memory_space<vmem>>, vector<1x256xf32>
    %cst_7 = arith.constant 0.000000e+00 : f32
    %32 = vector.broadcast %cst_7 : f32 to vector<1x256xf32>
    %33 = arith.select %4, %31, %32 : vector<1x256xi1>, vector<1x256xf32>
    %c3_i32 = arith.constant 3 : i32
    %34 = vector.broadcast %c3_i32 : i32 to vector<16x256xi32>
    %35 = arith.cmpi eq, %7, %34 : vector<16x256xi32>
    %36 = vector.shape_cast %33 : vector<1x256xf32> to vector<1x256xf32>
    %37 = vector.broadcast %36 : vector<1x256xf32> to vector<16x256xf32>
    %38 = arith.select %35, %37, %30 : vector<16x256xi1>, vector<16x256xf32>
    %c0_8 = arith.constant 0 : index
    %c128 = arith.constant 128 : index
    %39 = vector.load %arg0[%c0_8, %c128] : memref<1x512xf32, #tpu.memory_space<vmem>>, vector<1x256xf32>
    %c4_i32 = arith.constant 4 : i32
    %40 = vector.broadcast %c4_i32 : i32 to vector<16x256xi32>
    %41 = arith.cmpi eq, %7, %40 : vector<16x256xi32>
    %42 = vector.shape_cast %39 : vector<1x256xf32> to vector<1x256xf32>
    %43 = vector.broadcast %42 : vector<1x256xf32> to vector<16x256xf32>
    %44 = arith.select %41, %43, %38 : vector<16x256xi1>, vector<16x256xf32>
    %c0_9 = arith.constant 0 : index
    %c129 = arith.constant 129 : index
    %45 = vector.load %arg0[%c0_9, %c129] : memref<1x512xf32, #tpu.memory_space<vmem>>, vector<1x256xf32>
    %cst_10 = arith.constant 0.000000e+00 : f32
    %46 = vector.broadcast %cst_10 : f32 to vector<1x256xf32>
    %47 = arith.select %6, %45, %46 : vector<1x256xi1>, vector<1x256xf32>
    %c5_i32 = arith.constant 5 : i32
    %48 = vector.broadcast %c5_i32 : i32 to vector<16x256xi32>
    %49 = arith.cmpi eq, %7, %48 : vector<16x256xi32>
    %50 = vector.shape_cast %47 : vector<1x256xf32> to vector<1x256xf32>
    %51 = vector.broadcast %50 : vector<1x256xf32> to vector<16x256xf32>
    %52 = arith.select %49, %51, %44 : vector<16x256xi1>, vector<16x256xf32>
    %c0_11 = arith.constant 0 : index
    %c143 = arith.constant 143 : index
    %53 = vector.load %arg0[%c0_11, %c143] : memref<1x512xf32, #tpu.memory_space<vmem>>, vector<1x256xf32>
    %cst_12 = arith.constant 0.000000e+00 : f32
    %54 = vector.broadcast %cst_12 : f32 to vector<1x256xf32>
    %55 = arith.select %4, %53, %54 : vector<1x256xi1>, vector<1x256xf32>
    %c6_i32 = arith.constant 6 : i32
    %56 = vector.broadcast %c6_i32 : i32 to vector<16x256xi32>
    %57 = arith.cmpi eq, %7, %56 : vector<16x256xi32>
    %58 = vector.shape_cast %55 : vector<1x256xf32> to vector<1x256xf32>
    %59 = vector.broadcast %58 : vector<1x256xf32> to vector<16x256xf32>
    %60 = arith.select %57, %59, %52 : vector<16x256xi1>, vector<16x256xf32>
    %c0_13 = arith.constant 0 : index
    %c144 = arith.constant 144 : index
    %61 = vector.load %arg0[%c0_13, %c144] : memref<1x512xf32, #tpu.memory_space<vmem>>, vector<1x256xf32>
    %c7_i32 = arith.constant 7 : i32
    %62 = vector.broadcast %c7_i32 : i32 to vector<16x256xi32>
    %63 = arith.cmpi eq, %7, %62 : vector<16x256xi32>
    %64 = vector.shape_cast %61 : vector<1x256xf32> to vector<1x256xf32>
    %65 = vector.broadcast %64 : vector<1x256xf32> to vector<16x256xf32>
    %66 = arith.select %63, %65, %60 : vector<16x256xi1>, vector<16x256xf32>
    %c0_14 = arith.constant 0 : index
    %c145 = arith.constant 145 : index
    %67 = vector.load %arg0[%c0_14, %c145] : memref<1x512xf32, #tpu.memory_space<vmem>>, vector<1x256xf32>
    %cst_15 = arith.constant 0.000000e+00 : f32
    %68 = vector.broadcast %cst_15 : f32 to vector<1x256xf32>
    %69 = arith.select %6, %67, %68 : vector<1x256xi1>, vector<1x256xf32>
    %c8_i32 = arith.constant 8 : i32
    %70 = vector.broadcast %c8_i32 : i32 to vector<16x256xi32>
    %71 = arith.cmpi eq, %7, %70 : vector<16x256xi32>
    %72 = vector.shape_cast %69 : vector<1x256xf32> to vector<1x256xf32>
    %73 = vector.broadcast %72 : vector<1x256xf32> to vector<16x256xf32>
    %74 = arith.select %71, %73, %66 : vector<16x256xi1>, vector<16x256xf32>
    %c9_i32 = arith.constant 9 : i32
    %75 = vector.broadcast %c9_i32 : i32 to vector<16x256xi32>
    %76 = arith.cmpi eq, %7, %75 : vector<16x256xi32>
    %cst_16 = arith.constant 1.000000e+00 : f32
    %77 = vector.broadcast %cst_16 : f32 to vector<16x256xf32>
    %78 = arith.select %76, %77, %74 : vector<16x256xi1>, vector<16x256xf32>
    %79 = arith.truncf %78 : vector<16x256xf32> to vector<16x256xbf16>
    %c0_17 = arith.constant 0 : index
    %c0_18 = arith.constant 0 : index
    %80 = vector.load %arg1[%c0_17, %c0_18] : memref<64x16xbf16, #tpu.memory_space<vmem>>, vector<64x16xbf16>
    %cst_19 = arith.constant dense<0.000000e+00> : vector<64x256xf32>
    %81 = tpu.matmul %80, %79, %cst_19 {dimension_numbers = #tpu.dot_dimension_numbers<[1], [0], [0], [1], [0, 0, 1, 1], [], []>} : vector<64x16xbf16>, vector<16x256xbf16>, vector<64x256xf32> -> vector<64x256xf32>
    %cst_20 = arith.constant 0.000000e+00 : f32
    %82 = vector.broadcast %cst_20 : f32 to vector<64x256xf32>
    %83 = arith.maximumf %81, %82 : vector<64x256xf32>
    %84 = arith.truncf %83 : vector<64x256xf32> to vector<64x256xbf16>
    %cst_21 = arith.constant 0.000000e+00 : bf16
    %85 = vector.broadcast %cst_21 : bf16 to vector<64x128xbf16>
    %c0_22 = arith.constant 0 : index
    %c0_23 = arith.constant 0 : index
    %86 = vector.load %arg5[%c0_22, %c0_23] : memref<64x512xbf16, #tpu.memory_space<vmem>>, vector<64x128xbf16>
    tpu.vector_store %arg5[%c0_22, %c0_23], %85 {strides = array<i32>} : memref<64x512xbf16, #tpu.memory_space<vmem>>, vector<64x128xbf16>,
    %cst_24 = arith.constant 0.000000e+00 : bf16
    %87 = vector.broadcast %cst_24 : bf16 to vector<64x128xbf16>
    %c0_25 = arith.constant 0 : index
    %c384 = arith.constant 384 : index
    %88 = vector.load %arg5[%c0_25, %c384] : memref<64x512xbf16, #tpu.memory_space<vmem>>, vector<64x128xbf16>
    tpu.vector_store %arg5[%c0_25, %c384], %87 {strides = array<i32>} : memref<64x512xbf16, #tpu.memory_space<vmem>>, vector<64x128xbf16>,
    %c0_26 = arith.constant 0 : index
    %c128_27 = arith.constant 128 : index
    %89 = vector.load %arg5[%c0_26, %c128_27] : memref<64x512xbf16, #tpu.memory_space<vmem>>, vector<64x256xbf16>
    tpu.vector_store %arg5[%c0_26, %c128_27], %84 {strides = array<i32>} : memref<64x512xbf16, #tpu.memory_space<vmem>>, vector<64x256xbf16>,
    %c0_28 = arith.constant 0 : index
    %c111_29 = arith.constant 111 : index
    %90 = vector.load %arg5[%c0_28, %c111_29] : memref<64x512xbf16, #tpu.memory_space<vmem>>, vector<64x256xbf16>
    %c0_30 = arith.constant 0 : index
    %c127_31 = arith.constant 127 : index
    %91 = vector.load %arg5[%c0_30, %c127_31] : memref<64x512xbf16, #tpu.memory_space<vmem>>, vector<64x256xbf16>
    %c0_32 = arith.constant 0 : index
    %c143_33 = arith.constant 143 : index
    %92 = vector.load %arg5[%c0_32, %c143_33] : memref<64x512xbf16, #tpu.memory_space<vmem>>, vector<64x256xbf16>
    %93 = tpu.concatenate %90, %91, %92 in 0 : vector<64x256xbf16>, vector<64x256xbf16>, vector<64x256xbf16> -> vector<192x256xbf16>
    %c0_i32_34 = arith.constant 0 : i32
    %94 = arith.sitofp %c0_i32_34 : i32 to bf16
    %95 = vector.shape_cast %4 : vector<1x256xi1> to vector<1x256xi1>
    %96 = vector.broadcast %95 : vector<1x256xi1> to vector<192x256xi1>
    %97 = vector.broadcast %94 : bf16 to vector<192x256xbf16>
    %98 = arith.select %96, %93, %97 : vector<192x256xi1>, vector<192x256xbf16>
    %c0_35 = arith.constant 0 : index
    %c0_36 = arith.constant 0 : index
    %c0_37 = arith.constant 0 : index
    %99 = vector.load %arg2[%c0_35, %c0_36, %c0_37] : memref<3x16x192xbf16, #tpu.memory_space<vmem>>, vector<1x16x192xbf16>
    %100 = vector.shape_cast %99 : vector<1x16x192xbf16> to vector<16x192xbf16>
    %cst_38 = arith.constant dense<0.000000e+00> : vector<16x256xf32>
    %101 = tpu.matmul %100, %98, %cst_38 {dimension_numbers = #tpu.dot_dimension_numbers<[1], [0], [0], [1], [0, 0, 1, 1], [], []>} : vector<16x192xbf16>, vector<192x256xbf16>, vector<16x256xf32> -> vector<16x256xf32>
    %c0_39 = arith.constant 0 : index
    %c112_40 = arith.constant 112 : index
    %102 = vector.load %arg5[%c0_39, %c112_40] : memref<64x512xbf16, #tpu.memory_space<vmem>>, vector<64x256xbf16>
    %c0_41 = arith.constant 0 : index
    %c128_42 = arith.constant 128 : index
    %103 = vector.load %arg5[%c0_41, %c128_42] : memref<64x512xbf16, #tpu.memory_space<vmem>>, vector<64x256xbf16>
    %c0_43 = arith.constant 0 : index
    %c144_44 = arith.constant 144 : index
    %104 = vector.load %arg5[%c0_43, %c144_44] : memref<64x512xbf16, #tpu.memory_space<vmem>>, vector<64x256xbf16>
    %105 = tpu.concatenate %102, %103, %104 in 0 : vector<64x256xbf16>, vector<64x256xbf16>, vector<64x256xbf16> -> vector<192x256xbf16>
    %c1 = arith.constant 1 : index
    %c0_45 = arith.constant 0 : index
    %c0_46 = arith.constant 0 : index
    %106 = vector.load %arg2[%c1, %c0_45, %c0_46] : memref<3x16x192xbf16, #tpu.memory_space<vmem>>, vector<1x16x192xbf16>
    %107 = vector.shape_cast %106 : vector<1x16x192xbf16> to vector<16x192xbf16>
    %cst_47 = arith.constant dense<0.000000e+00> : vector<16x256xf32>
    %108 = tpu.matmul %107, %105, %cst_47 {dimension_numbers = #tpu.dot_dimension_numbers<[1], [0], [0], [1], [0, 0, 1, 1], [], []>} : vector<16x192xbf16>, vector<192x256xbf16>, vector<16x256xf32> -> vector<16x256xf32>
    %109 = arith.addf %101, %108 : vector<16x256xf32>
    %c0_48 = arith.constant 0 : index
    %c113_49 = arith.constant 113 : index
    %110 = vector.load %arg5[%c0_48, %c113_49] : memref<64x512xbf16, #tpu.memory_space<vmem>>, vector<64x256xbf16>
    %c0_50 = arith.constant 0 : index
    %c129_51 = arith.constant 129 : index
    %111 = vector.load %arg5[%c0_50, %c129_51] : memref<64x512xbf16, #tpu.memory_space<vmem>>, vector<64x256xbf16>
    %c0_52 = arith.constant 0 : index
    %c145_53 = arith.constant 145 : index
    %112 = vector.load %arg5[%c0_52, %c145_53] : memref<64x512xbf16, #tpu.memory_space<vmem>>, vector<64x256xbf16>
    %113 = tpu.concatenate %110, %111, %112 in 0 : vector<64x256xbf16>, vector<64x256xbf16>, vector<64x256xbf16> -> vector<192x256xbf16>
    %c0_i32_54 = arith.constant 0 : i32
    %114 = arith.sitofp %c0_i32_54 : i32 to bf16
    %115 = vector.shape_cast %6 : vector<1x256xi1> to vector<1x256xi1>
    %116 = vector.broadcast %115 : vector<1x256xi1> to vector<192x256xi1>
    %117 = vector.broadcast %114 : bf16 to vector<192x256xbf16>
    %118 = arith.select %116, %113, %117 : vector<192x256xi1>, vector<192x256xbf16>
    %c2 = arith.constant 2 : index
    %c0_55 = arith.constant 0 : index
    %c0_56 = arith.constant 0 : index
    %119 = vector.load %arg2[%c2, %c0_55, %c0_56] : memref<3x16x192xbf16, #tpu.memory_space<vmem>>, vector<1x16x192xbf16>
    %120 = vector.shape_cast %119 : vector<1x16x192xbf16> to vector<16x192xbf16>
    %cst_57 = arith.constant dense<0.000000e+00> : vector<16x256xf32>
    %121 = tpu.matmul %120, %118, %cst_57 {dimension_numbers = #tpu.dot_dimension_numbers<[1], [0], [0], [1], [0, 0, 1, 1], [], []>} : vector<16x192xbf16>, vector<192x256xbf16>, vector<16x256xf32> -> vector<16x256xf32>
    %122 = arith.addf %109, %121 : vector<16x256xf32>
    %c0_58 = arith.constant 0 : index
    %c0_59 = arith.constant 0 : index
    %123 = vector.load %arg3[%c0_58, %c0_59] : memref<16x1xf32, #tpu.memory_space<vmem>>, vector<16x1xf32>
    %124 = vector.broadcast %123 : vector<16x1xf32> to vector<16x256xf32>
    %125 = arith.addf %122, %124 : vector<16x256xf32>
    %cst_60 = arith.constant 0.000000e+00 : f32
    %126 = vector.broadcast %cst_60 : f32 to vector<16x256xf32>
    %127 = arith.maximumf %125, %126 : vector<16x256xf32>
    %128 = vector.extract_strided_slice %127 {offsets = [0, 0], sizes = [10, 256], strides = [1, 1]} : vector<16x256xf32> to vector<10x256xf32>
    %c0_61 = arith.constant 0 : index
    %c0_62 = arith.constant 0 : index
    %129 = vector.load %arg4[%c0_61, %c0_62] : memref<10x256xf32, #tpu.memory_space<vmem>>, vector<10x256xf32>
    tpu.vector_store %arg4[%c0_61, %c0_62], %128 {strides = array<i32>} : memref<10x256xf32, #tpu.memory_space<vmem>>, vector<10x256xf32>,
    return
  }
}

</mosaic_0001>

<bundles_post_ra>
// kernel: edge_convolution_model.1
= control target key start
LH: loop header
LB: loop body
LE: loop exit
PB: predicated region body
PF: predicated region fallthrough
CT: control target
= control target key end

     0   :  { %v20_v0 = vlaneseq  ;;  %s1869_s17 = smov 17   ;;  %s1870_s20 = smov 15   ;;  %vm52_vm0 = vcmask 138240   ;;  %v1875_v33 = vmov 0.0   ;;  %vm90_vm5 = vcmask 916480   ;;  %s2978_s0 = inlined_call_operand.vmem [shape: f32[1,512], index: 0, kind: input, shape index: {}]   ;;  %s2979_s1 = inlined_call_operand.vmem [shape: bf16[64,16], index: 1, kind: input, shape index: {}]   ;;  %s2980_s2 = inlined_call_operand.vmem [shape: bf16[3,16,192], index: 2, kind: input, shape index: {}]   ;;  %s2981_s3 = inlined_call_operand.vmem [shape: f32[16,1], index: 3, kind: input, shape index: {}]   ;;  %s2982_s4 = inlined_call_operand.vmem [shape: f32[10,256], index: 4, kind: output, shape index: {}]  }
   0x1   :  { %v32_v2 = vld [vmem:[%s2978_s0] sm:$0x7]  ;;  %s1871_s21 = smov 1   ;;  %s1872_s22 = smov 127   ;;  %vm111_vm6 = vcmask 121856   ;;  %vm165_vm7 = vcmask 7168  }
   0x2   :  { %v1905_v1 = vshrl.u32 %v20_v0, 7  ;;  %v204_v10 = vld [vmem:[%s2978_s0 + $0x1] sm:$0x7]  ;;  %v1935_v14 = vand.u32 127, %v20_v0  ;;  %s1873_s23 = smov 113   ;;  %s1874_s24 = smov 112  }
   0x3   :  { %s1876_s25 = smov 16   ;;  %vm224_vm8 = vcmask 1039360   ;;  %vm251_vm10 = vcmask 924672   ;;  %vm146_vm13 = vcmask 130048   ;;  %s1879_s28 = smov 96  }
   0x4   :  { %v1911_v3 = vsub.s32 0, %v1905_v1  ;;  %v1914_v4 = vsub.s32 1, %v1905_v1  ;;  %v44_v7 = vsub.s32 2, %v1905_v1  ;;  %v1938_v15 = vadd.s32 128, %v1935_v14 }
   0x5   :  { %v23_v16 = vand.u32 15, %v1935_v14  ;;  %vm59_vm3 = vcmp.eq.s32.totalorder %v1905_v1, 0  ;;  %vm73_vm4 = vcmp.eq.s32.totalorder %v1905_v1, 1  ;;  %vm118_vm12 = vcmp.eq.s32.totalorder %v1905_v1, 2 }
   0x6   :  { %v37_v5 = vrot.slane %v32_v2, %v1911_v3  ;;  %v41_v6 = vrot.slane %v32_v2, %v1914_v4  ;;  %v45_v9 = vrot.slane %v32_v2, %v44_v7  ;;  %v1926_v11 = vrot.slane %v204_v10, %v1911_v3 }
   0x7   :  { %v1929_v12 = vrot.slane %v204_v10, %v1914_v4  ;;  %v24_v17 = vand.u32 15, %v1938_v15  ;;  %vm1944_vm1 = vcmp.ge.s32.totalorder %v23_v16, 1  ;;  %v1968_v34 = vrot.slane %v204_v10, %v44_v7 }
   0x8   :  { %v1746_v8 = vpack.i.bf16 %v41_v6, %v37_v5  ;;  %vm1982_vm9 = vcmp.lt.s32.totalorder %v23_v16, 15  ;;  %vm172_vm14 = vcmp.eq.s32.totalorder %v1905_v1, 3  ;;  %vm187_vm15 = vcmp.eq.s32.totalorder %v1905_v1, 4 }
   0x9   :  { %v1771_v13 = vpack.i.bf16 %v1929_v12, %v1926_v11  ;;  %vm1951_vm2 = vcmp.ge.s32.totalorder %v24_v17, 1  ;;  %vm1998_vm11 = vcmp.lt.s32.totalorder %v24_v17, 15 }
   0xa   :  { %1747 = vrot.lane.b32.xlu0 %v1746_v8, %s1869_s17 }
   0xe   :  { %50 = vrot.lane.b32.xlu0 %v45_v9, %s1869_s17 }
  0x12   :  { %1762 = vrot.lane.b32.xlu0 %v1746_v8, %s1870_s20 }
  0x16   :  { %1767 = vrot.lane.b32.xlu0 %v1746_v8, %s1871_s21 }
  0x1a   :  { %1772 = vrot.lane.b32.xlu0 %v1771_v13, %s1872_s22 }
  0x1e   :  { %1777 = vrot.lane.b32.xlu0 %v1771_v13, %s1873_s23 }
  0x7c   :  { %v1748_v18 = vpop.permute.xlu0 %1747 }
  0x7d   :  { %v1750_v19 = vunpack.i.h.bf16 %v1748_v18  ;;  %v1749_v20 = vunpack.i.l.bf16 %v1748_v18 }
  0x7f   :  { %v53_v23 = vsel %vm52_vm0, %v1749_v20, %v1750_v19 }
  0x80   :  { %v51_v24 = vpop.permute.xlu0 %50  ;;  %v57_v25 = vsel %vm1944_vm1, %v53_v23, 0.0 }
  0x81   :  { %v54_v26 = vsel %vm52_vm0, %v1750_v19, %v51_v24  ;;  %v64_v27 = vrot.slane %v57_v25, %v1911_v3  ;;  %v186_v19 = vld [vmem:[%s2978_s0 + $0x1] sm:$0x3]  ;;  %s1877_s0 = smov 111  }
  0x82   :  { %v58_v28 = vsel %vm1951_vm2, %v54_v26, 0.0 }
  0x83   :  { %v68_v29 = vrot.slane %v58_v28, %v1911_v3  ;;  %v69_v30 = vsel %vm59_vm3, %v64_v27, 0.0 }
  0x84   :  { %v1763_v49 = vpop.permute.xlu0 %1762 }
  0x85   :  { %v70_v31 = vsel %vm59_vm3, %v68_v29, 0.0  ;;  %v1765_v53 = vunpack.i.h.bf16 %v1763_v49  ;;  %v1764_v54 = vunpack.i.l.bf16 %v1763_v49  ;;  %vm231_vm3 = vcmp.eq.s32.totalorder %v1905_v1, 5 }
  0x86   :  { %v1751_v32 = vpack.i.bf16 %v70_v31, %v69_v30  ;;  %v193_v30 = vrot.slane %v186_v19, %v1911_v3  ;;  %v197_v31 = vrot.slane %v186_v19, %v1914_v4  ;;  %v1878_v19 = vmov 0  }
  0x87   :  { %v112_v62 = vsel %vm111_vm6, %v1764_v54, %v1765_v53  ;;  %436 = vmatprep.mubr.bf16.mxu0 %v1878_v19  ;;  %501 = vst [vmem:[#allocation2] sm:$0xf] %v1878_v19  ;;  %502 = vst [vmem:[#allocation2 + $0x10] sm:$0xf] %v1878_v19  ;;  %1826 = vset.pattern.permute.xlu0 %v1878_v19 }
  0x88   :  { %1752 = vrot.lane.b32.xlu1 %v1751_v32, %s1874_s24  ;;  %v1768_v50 = vpop.permute.xlu0 %1767  ;;  %503 = vst [vmem:[#allocation2 + $0x20] sm:$0xf] %v1878_v19  ;;  %504 = vst [vmem:[#allocation2 + $0x30] sm:$0xf] %v1878_v19 }
  0x89   :  { %v1770_v55 = vunpack.i.h.bf16 %v1768_v50  ;;  %v1769_v56 = vunpack.i.l.bf16 %v1768_v50  ;;  %505 = vst [vmem:[#allocation2 + $0x40] sm:$0xf] %v1878_v19  ;;  %506 = vst [vmem:[#allocation2 + $0x50] sm:$0xf] %v1878_v19  ;;  %1827 = vset.pattern.permute.xlu1 %v1878_v19 }
  0x8a   :  { %507 = vst [vmem:[#allocation2 + $0x60] sm:$0xf] %v1878_v19  ;;  %508 = vst [vmem:[#allocation2 + $0x70] sm:$0xf] %v1878_v19 }
  0x8b   :  { %v166_v2 = vsel %vm165_vm7, %v1769_v56, %v1770_v55  ;;  %509 = vst [vmem:[#allocation2 + $0xc] sm:$0xf] %v1878_v19  ;;  %510 = vst [vmem:[#allocation2 + $0x1c] sm:$0xf] %v1878_v19 }
  0x8c   :  { %1757 = vrot.lane.b32.xlu1 %v1875_v33, %s1874_s24  ;;  %v1773_v52 = vpop.permute.xlu0 %1772  ;;  %v170_v7 = vsel %vm1944_vm1, %v166_v2, 0.0  ;;  %511 = vst [vmem:[#allocation2 + $0x2c] sm:$0xf] %v1878_v19  ;;  %512 = vst [vmem:[#allocation2 + $0x3c] sm:$0xf] %v1878_v19 }
  0x8d   :  { %v1775_v57 = vunpack.i.h.bf16 %v1773_v52  ;;  %v1774_v58 = vunpack.i.l.bf16 %v1773_v52  ;;  %v177_v20 = vrot.slane %v170_v7, %v1911_v3  ;;  %513 = vst [vmem:[#allocation2 + $0x4c] sm:$0xf] %v1878_v19  ;;  %514 = vst [vmem:[#allocation2 + $0x5c] sm:$0xf] %v1878_v19 }
  0x8e   :  { %515 = vst [vmem:[#allocation2 + $0x6c] sm:$0xf] %v1878_v19  ;;  %516 = vst [vmem:[#allocation2 + $0x7c] sm:$0xf] %v1878_v19 }
  0x90   :  { %109 = vrot.lane.b32.xlu1 %v45_v9, %s1870_s20  ;;  %v1778_v60 = vpop.permute.xlu0 %1777 }
  0x91   :  { %v1780_v63 = vunpack.i.h.bf16 %v1778_v60  ;;  %v1779_v0 = vunpack.i.l.bf16 %v1778_v60 }
  0x93   :  { %v252_v10 = vsel %vm251_vm10, %v1779_v0, %v1780_v63 }
  0x94   :  { %163 = vrot.lane.b32.xlu1 %v45_v9, %s1871_s21  ;;  %v256_v24 = vsel %vm1944_vm1, %v252_v10, 0.0 }
  0x95   :  { %v263_v56 = vrot.slane %v256_v24, %v1911_v3  ;;  %v815_v24 = vsub.s32 4, %v1905_v1 }
  0x98   :  { %222 = vrot.lane.b32.xlu1 %v1968_v34, %s1872_s22 }
  0xfa   :  { %v1753_v35 = vpop.permute.xlu1 %1752 }
  0xfb   :  { %v1755_v36 = vunpack.i.h.bf16 %v1753_v35  ;;  %v1754_v37 = vunpack.i.l.bf16 %v1753_v35 }
  0xfd   :  { %v91_v38 = vsel %vm90_vm5, %v1754_v37, %v1755_v36  ;;  %v99_v39 = vsel %vm73_vm4, %v37_v5, %v1754_v37  ;;  %v101_v45 = vsel %vm73_vm4, %v45_v9, %v1755_v36  ;;  %v225_v5 = vsel %vm224_vm8, %v1774_v58, %v1775_v57 }
  0xfe   :  { %v1758_v40 = vpop.permute.xlu1 %1757  ;;  %v100_v41 = vsel %vm73_vm4, %v41_v6, %v91_v38  ;;  %v116_v6 = vsel %vm1982_vm9, %v112_v62, 0.0  ;;  %v229_v8 = vsel %vm1982_vm9, %v225_v5, 0.0  ;;  %vm258_vm4 = vcmp.eq.s32.totalorder %v1905_v1, 6 }
  0xff   :  { %v1760_v42 = vunpack.i.h.bf16 %v1758_v40  ;;  %v1759_v43 = vunpack.i.l.bf16 %v1758_v40  ;;  %v1786_v44 = vpack.i.bf16 %v100_v41, %v99_v39  ;;  %v123_v18 = vrot.slane %v116_v6, %v1911_v3 }
 0x100   :  { %v236_v15 = vrot.slane %v229_v8, %v1911_v3 }
 0x101   :  { %1787 = vrot.lane.b32.xlu0 %v1786_v44, %s1876_s25  ;;  %v1781_v46 = vpack.i.bf16 %v1759_v43, %v101_v45  ;;  %v92_v47 = vsel %vm90_vm5, %v1759_v43, %v1760_v42 }
 0x102   :  { %v1791_v48 = vpack.i.bf16 %v1760_v42, %v92_v47  ;;  %v110_v51 = vpop.permute.xlu1 %109 }
 0x103   :  { %1782 = vrot.lane.b32.xlu1 %v1781_v46, %s1876_s25  ;;  %v113_v14 = vsel %vm111_vm6, %v1765_v53, %v110_v51 }
 0x104   :  { %v117_v25 = vsel %vm1998_vm11, %v113_v14, 0.0 }
 0x105   :  { %1792 = vrot.lane.b32.xlu0 %v1791_v48, %s1876_s25  ;;  %v127_v36 = vrot.slane %v117_v25, %v1911_v3 }
 0x106   :  { %v164_v59 = vpop.permute.xlu1 %163 }
 0x107   :  { %249 = vrot.lane.b32.xlu1 %v1968_v34, %s1873_s23  ;;  %v167_v16 = vsel %vm165_vm7, %v1770_v55, %v164_v59  ;;  %v1806_v59 = vpack.i.bf16 %v1968_v34, %v1929_v12  ;;  %vm272_vm7 = vcmp.eq.s32.totalorder %v1905_v1, 7 }
 0x108   :  { %v171_v26 = vsel %vm1951_vm2, %v167_v16, 0.0 }
 0x109   :  { %v181_v37 = vrot.slane %v171_v26, %v1911_v3 }
 0x10a   :  { %v223_v9 = vpop.permute.xlu1 %222 }
 0x10b   :  { %v226_v17 = vsel %vm224_vm8, %v1775_v57, %v223_v9  ;;  %vm807_vm8 = vmpackc.low %vm1951_vm2, %vm1944_vm1  ;;  %vm309_vm1 = vcmask 908288  }
 0x10c   :  { %v230_v32 = vsel %vm1998_vm11, %v226_v17, 0.0  ;;  %v1833_v17 = vld [vmem:[#allocation2 + $0x6c] ss:$16 sps:$4 sm:$0xff]   ;;  %v808_v25 = vsel %vm807_vm8, 65537, %v1878_v19  ;;  %vm1057_vm8 = vcmask 523264  }
 0x10d   :  { %v240_v44 = vrot.slane %v230_v32, %v1911_v3  ;;  %v816_v21 = vrot.slane %v808_v25, %v815_v24  ;;  %v812_v22 = vrot.slane %v808_v25, %v1911_v3 }
 0x173   :  { %v1788_v23 = vpop.permute.xlu0 %1787 }
 0x174   :  { %v1790_v27 = vunpack.i.h.bf16 %v1788_v23  ;;  %v1789_v28 = vunpack.i.l.bf16 %v1788_v23  ;;  %v1835_v23 = vld [vmem:[#allocation2 + $0x2c] ss:$16 sps:$4 sm:$0xff]  }
 0x175   :  { %v1783_v29 = vpop.permute.xlu1 %1782 }
 0x176   :  { %v147_v33 = vsel %vm146_vm13, %v1789_v28, %v1790_v27  ;;  %v1784_v35 = vunpack.i.l.bf16 %v1783_v29  ;;  %v1785_v39 = vunpack.i.h.bf16 %v1783_v29 }
 0x177   :  { %v155_v38 = vsel %vm118_vm12, %v123_v18, %v147_v33  ;;  %v1793_v40 = vpop.permute.xlu0 %1792 }
 0x178   :  { %v148_v41 = vsel %vm146_vm13, %v1790_v27, %v1784_v35  ;;  %v1795_v4 = vunpack.i.h.bf16 %v1793_v40  ;;  %v1794_v42 = vunpack.i.l.bf16 %v1793_v40  ;;  %v182_v43 = vsel %vm172_vm14, %v177_v20, %v155_v38 }
 0x179   :  { %v156_v45 = vsel %vm118_vm12, %v127_v36, %v148_v41  ;;  %v250_v46 = vpop.permute.xlu1 %249  ;;  %v200_v47 = vsel %vm187_vm15, %v193_v30, %v182_v43  ;;  %vm1364_vm12 = vmpackc.low %vm1998_vm11, %vm1982_vm9  ;;  %v31_v36 = vadd.s32 8, %v1905_v1 }
 0x17a   :  { %v253_v48 = vsel %vm251_vm10, %v1780_v63, %v250_v46  ;;  %v149_v49 = vsel %vm146_vm13, %v1785_v39, %v1794_v42  ;;  %v150_v50 = vsel %vm146_vm13, %v1794_v42, %v1795_v4  ;;  %v183_v51 = vsel %vm172_vm14, %v181_v37, %v156_v45 }
 0x17b   :  { %v257_v52 = vsel %vm1951_vm2, %v253_v48, 0.0  ;;  %v1796_v53 = vpack.i.bf16 %v150_v50, %v149_v49  ;;  %v201_v54 = vsel %vm187_vm15, %v197_v31, %v183_v51  ;;  %v241_v55 = vsel %vm231_vm3, %v236_v15, %v200_v47  ;;  %v1832_v15 = vld [vmem:[#allocation2 + $0x4c] ss:$16 sps:$4 sm:$0xff]  }
 0x17c   :  { %v267_v57 = vrot.slane %v257_v52, %v1911_v3  ;;  %v242_v58 = vsel %vm231_vm3, %v240_v44, %v201_v54  ;;  %v268_v60 = vsel %vm258_vm4, %v263_v56, %v241_v55  ;;  %v1365_v26 = vsel %vm1364_vm12, 65537, %v1878_v19  ;;  %v1828_v56 = vld [vmem:[%s2979_s1] sm:$0xff]  }
 0x17d   :  { %1797 = vrot.lane.b32.xlu1 %v1796_v53, %s1876_s25  ;;  %v1369_v27 = vrot.slane %v1365_v26, %v1911_v3  ;;  %v1373_v28 = vrot.slane %v1365_v26, %v815_v24  ;;  %vm317_vm2 = vcmp.eq.s32.totalorder %v31_v36, 8 }
 0x17e   :  { %v269_v62 = vsel %vm258_vm4, %v267_v57, %v242_v58  ;;  %v1830_v57 = vld [vmem:[%s2979_s1 + $0x10] sm:$0xff]   ;;  %v1831_v58 = vld [vmem:[%s2979_s1 + $0x18] sm:$0xff]  }
 0x17f   :  { %v1801_v63 = vpack.i.bf16 %v269_v62, %v268_v60 }
 0x181   :  { %1802 = vrot.lane.b32.xlu0 %v1801_v63, %s1876_s25  ;;  %1807 = vrot.lane.b32.xlu1 %v1806_v59, %s1877_s0 }
 0x185   :  { %303 = vrot.lane.b32.xlu0 %v1926_v11, %s1877_s0 }
 0x1ef   :  { %v1798_v0 = vpop.permute.xlu1 %1797 }
 0x1f0   :  { %v1800_v2 = vunpack.i.h.bf16 %v1798_v0  ;;  %v1799_v5 = vunpack.i.l.bf16 %v1798_v0 }
 0x1f2   :  { %v290_v6 = vsel %vm146_vm13, %v1799_v5, %v1800_v2 }
 0x1f3   :  { %v1803_v7 = vpop.permute.xlu0 %1802  ;;  %v1811_v8 = vpack.i.bf16 %v1800_v2, %v290_v6  ;;  %v1808_v29 = vpop.permute.xlu1 %1807 }
 0x1f4   :  { %v1805_v9 = vunpack.i.h.bf16 %v1803_v7  ;;  %v1804_v10 = vunpack.i.l.bf16 %v1803_v7  ;;  %v1810_v30 = vunpack.i.h.bf16 %v1808_v29  ;;  %v1809_v31 = vunpack.i.l.bf16 %v1808_v29 }
 0x1f5   :  { %1812 = vrot.lane.b32.xlu1 %v1811_v8, %s1874_s24 }
 0x1f6   :  { %v297_v14 = vsel %vm272_vm7, %v1926_v11, %v1804_v10  ;;  %v299_v16 = vsel %vm272_vm7, %v1968_v34, %v1805_v9  ;;  %v289_v18 = vsel %vm146_vm13, %v1804_v10, %v1805_v9  ;;  %v311_v32 = vsel %vm309_vm1, %v1809_v31, %v1810_v30 }
 0x1f7   :  { %v1821_v11 = vpack.i.bf16 %v297_v14, %v299_v16  ;;  %v298_v34 = vsel %vm272_vm7, %v1929_v12, %v289_v18  ;;  %v1834_v12 = vld [vmem:[#allocation2 + $0xc] ss:$16 sps:$4 sm:$0xff]   ;;  %v315_v33 = vsel %vm1998_vm11, %v311_v32, 0.0  ;;  %v304_v35 = vpop.permute.xlu0 %303  ;;  %vm357_vm11 = vcmp.eq.s32.totalorder %v31_v36, 9 }
 0x1f8   :  { %v1816_v20 = vpack.i.bf16 %v298_v34, %v1799_v5  ;;  %v310_v40 = vsel %vm309_vm1, %v304_v35, %v1809_v31  ;;  %v325_v41 = vrot.slane %v315_v33, %v1911_v3  ;;  %v2166_v31 = vld [vmem:[#allocation2] ss:$16 sps:$4 sm:$0xff]   ;;  %vm782_vm7 = vcmask 785408  }
 0x1f9   :  { %1822 = vrot.lane.b32.xlu1 %v1821_v11, %s1874_s24  ;;  %v314_v42 = vsel %vm1982_vm9, %v310_v40, 0.0 }
 0x1fa   :  { %1817 = vrot.lane.b32.xlu0 %v1816_v20, %s1874_s24  ;;  %v321_v48 = vrot.slane %v314_v42, %v1911_v3  ;;  %v1829_v3 = vld [vmem:[%s2979_s1 + $0x8] sm:$0xff]  }
 0x1fd   :  { %774 = vrot.lane.b32.xlu1 %v1832_v15, %s1879_s28 }
 0x1fe   :  { %780 = vrot.lane.b32.xlu0 %v1833_v17, %s1879_s28 }
 0x201   :  { %762 = vrot.lane.b32.xlu1 %v1834_v12, %s1879_s28 }
 0x202   :  { %768 = vrot.lane.b32.xlu0 %v1835_v23, %s1879_s28 }
 0x205   :  { %819 = vrot.lane.b32.xlu1 %v816_v21, %s1877_s0 }
 0x206   :  { %817 = vrot.lane.b32.xlu0 %v812_v22, %s1877_s0 }
 0x209   :  { %1374 = vrot.lane.b32.xlu1 %v1369_v27, %s1873_s23 }
 0x20a   :  { %1376 = vrot.lane.b32.xlu0 %v1373_v28, %s1873_s23 }
 0x20d   :  { %1338 = vrot.lane.b32.xlu1 %v1833_v17, %s1874_s24 }
 0x211   :  { %1332 = vrot.lane.b32.xlu1 %v1832_v15, %s1874_s24 }
 0x215   :  { %1326 = vrot.lane.b32.xlu1 %v1835_v23, %s1874_s24 }
 0x219   :  { %1320 = vrot.lane.b32.xlu1 %v1834_v12, %s1874_s24 }
 0x267   :  { %v1813_v37 = vpop.permute.xlu1 %1812 }
 0x268   :  { %v1815_v38 = vunpack.i.h.bf16 %v1813_v37  ;;  %v1814_v39 = vunpack.i.l.bf16 %v1813_v37 }
 0x26a   :  { %v347_v4 = vsel %vm90_vm5, %v1814_v39, %v1815_v38 }
 0x26b   :  { %v1823_v43 = vpop.permute.xlu1 %1822  ;;  %v355_v45 = vsel %vm317_vm2, %v325_v41, %v347_v4 }
 0x26c   :  { %v1824_v44 = vunpack.i.l.bf16 %v1823_v43  ;;  %v1818_v13 = vpop.permute.xlu0 %1817  ;;  %v1825_v1 = vunpack.i.h.bf16 %v1823_v43  ;;  %v361_v50 = vsel %vm357_vm11, 1.0, %v355_v45 }
 0x26d   :  { %v1820_v46 = vunpack.i.h.bf16 %v1818_v13  ;;  %v1819_v47 = vunpack.i.l.bf16 %v1818_v13 }
 0x26f   :  { %v345_v49 = vsel %vm90_vm5, %v1820_v46, %v1824_v44  ;;  %v346_v51 = vsel %vm90_vm5, %v1819_v47, %v1814_v39  ;;  %v344_v53 = vsel %vm90_vm5, %v1825_v1, %v1820_v46  ;;  %v2200_v46 = vld [vmem:[#allocation2 + $0x20] ss:$16 sps:$4 sm:$0xff]  }
 0x270   :  { %v363_v52 = vpack.c.bf16 %v361_v50, %v345_v49  ;;  %v354_v61 = vsel %vm317_vm2, %v321_v48, %v346_v51  ;;  %v2219_v50 = vpop.permute.xlu1 %774  ;;  %v2223_v51 = vpop.permute.xlu0 %780 }
 0x271   :  { %v360_v54 = vsel %vm357_vm11, 1.0, %v354_v61 }
 0x272   :  { %418 = vmatprep.subr.bf16.mxu0 %v363_v52  ;;  %v362_v55 = vpack.c.bf16 %v360_v54, %v344_v53  ;;  %v2233_v53 = vld [vmem:[#allocation2 + $0x40] ss:$16 sps:$4 sm:$0xff]  }
 0x274   :  { %419 = vmatpush1.bf16.msra.mxu0 %v362_v55  ;;  %v2227_v61 = vpop.permute.xlu1 %762  ;;  %v2235_v54 = vpop.permute.xlu0 %768 }
 0x277   :  { %1670 = vmatmul.mubr.msk.bf16.vlgmr.msra.gmra.mxu0 %vm146_vm13, %v1828_v56 }
 0x278   :  { %446 = vmatprep.mubr.bf16.mxu0 %v1878_v19  ;;  %v2241_v55 = vpop.permute.xlu1 %819 }
 0x279   :  { %vm825_vm9 = vcmp.ne.s16.totalorder %v2241_v55, 0 }
 0x27f   :  { %1671 = vmatmul.mubr.msk.bf16.gmra.mxu0 %vm146_vm13, %v1829_v3 }
 0x280   :  { %456 = vmatprep.mubr.bf16.mxu0 %v1878_v19 }
 0x287   :  { %1672 = vmatmul.mubr.msk.bf16.gmra.mxu0 %vm146_vm13, %v1830_v57  ;;  %v2249_v57 = vpop.permute.xlu0 %817 }
 0x288   :  { %466 = vmatprep.mubr.bf16.mxu0 %v1878_v19  ;;  %vm823_vm15 = vcmp.ne.s16.totalorder %v2249_v57, 0 }
 0x28f   :  { %1673 = vmatmul.mubr.msk.bf16.gmra.mxu0 %vm146_vm13, %v1831_v58  ;;  %v2254_v58 = vsel %vm309_vm1, %v2249_v57, %v2241_v55 }
 0x290   :  { %vm824_vm14 = vcmp.ne.s16.totalorder %v2254_v58, 0 }
 0x337   :  { %v438_v59 = vpop.f32.mrf.mxu0 }
 0x338   :  { %v477_v62 = vmax.f32 %v438_v59, 0.0 }
 0x339   :  { %v440_v60 = vpop.f32.mrf.mxu0 }
 0x33a   :  { %v478_v63 = vmax.f32 %v440_v60, 0.0 }
 0x33b   :  { %v442_v0 = vpop.f32.mrf.mxu0 }
 0x33c   :  { %v1727_v2 = vpack.c.bf16 %v478_v63, %v477_v62  ;;  %v479_v6 = vmax.f32 %v442_v0, 0.0  ;;  %v2277_v0 = vpop.permute.xlu1 %1374 }
 0x33d   :  { %v444_v5 = vpop.f32.mrf.mxu0 }
 0x33e   :  { %557 = vst [vmem:[#allocation2 + $0x4] sm:$0xff] %v1727_v2  ;;  %v480_v7 = vmax.f32 %v444_v5, 0.0  ;;  %v1862_v19 = vpack.c.bf16 %v479_v6, %v477_v62  ;;  %v832_v62 = vsel %vm823_vm15, %v2233_v53, 0  ;;  %v2279_v2 = vpop.permute.xlu0 %1376 }
 0x33f   :  { %v448_v8 = vpop.f32.mrf.mxu0  ;;  %vm1382_vm4 = vcmp.ne.s16.totalorder %v2279_v2, 0 }
 0x340   :  { %v1728_v9 = vpack.c.bf16 %v480_v7, %v479_v6  ;;  %v481_v10 = vmax.f32 %v448_v8, 0.0  ;;  %v1861_v18 = vpack.c.bf16 %v480_v7, %v478_v63  ;;  %904 = vrot.lane.b32.xlu0 %v1862_v19, %s1874_s24  ;;  %v2283_v6 = vpop.permute.xlu1 %1338  ;;  %v2288_v7 = vsel %vm251_vm10, %v2277_v0, %v2279_v2 }
 0x341   :  { %v450_v14 = vpop.f32.mrf.mxu0  ;;  %vm1381_vm3 = vcmp.ne.s16.totalorder %v2288_v7, 0  ;;  %vm1380_vm10 = vcmp.ne.s16.totalorder %v2277_v0, 0  ;;  %v1638_v7 = vld [vmem:[%s2981_s3] sm:$0xff] }
 0x342   :  { %558 = vst [vmem:[#allocation2 + $0x14] sm:$0xff] %v1728_v9  ;;  %v482_v16 = vmax.f32 %v450_v14, 0.0  ;;  %906 = vrot.lane.b32.xlu1 %v1861_v18, %s1874_s24  ;;  %v1851_v9 = vld [vmem:[#allocation2 + $0x60] ss:$16 sps:$4 sm:$0xff]  }
 0x343   :  { %v452_v11 = vpop.f32.mrf.mxu0 }
 0x344   :  { %v1729_v34 = vpack.c.bf16 %v482_v16, %v481_v10  ;;  %v483_v20 = vmax.f32 %v452_v11, 0.0  ;;  %760 = vrot.lane.b32.xlu0 %v1861_v18, %s1879_s28  ;;  %v2299_v14 = vpop.permute.xlu1 %1332 }
 0x345   :  { %v454_v15 = vpop.f32.mrf.mxu0 }
 0x346   :  { %559 = vst [vmem:[#allocation2 + $0x24] sm:$0xff] %v1729_v34  ;;  %v484_v17 = vmax.f32 %v454_v15, 0.0  ;;  %758 = vrot.lane.b32.xlu1 %v1862_v19, %s1879_s28  ;;  %v1864_v13 = vpack.c.bf16 %v483_v20, %v481_v10  ;;  %v835_v15 = vsel %vm823_vm15, %v1851_v9, 0 }
 0x347   :  { %v458_v12 = vpop.f32.mrf.mxu0 }
 0x348   :  { %v1730_v23 = vpack.c.bf16 %v484_v17, %v483_v20  ;;  %v485_v24 = vmax.f32 %v458_v12, 0.0  ;;  %v1863_v44 = vpack.c.bf16 %v484_v17, %v482_v16  ;;  %v1392_v16 = vsel %vm1380_vm10, %v1851_v9, 0 }
 0x349   :  { %v2158_v25 = vld [vmem:[#allocation2 + $0x8] ss:$16 sps:$4 sm:$0xff]   ;;  %v460_v21 = vpop.f32.mrf.mxu0  ;;  %v2160_v22 = vld [vmem:[#allocation2 + $0x4] ss:$16 sps:$4 sm:$0xff]  }
 0x34a   :  { %560 = vst [vmem:[#allocation2 + $0x34] sm:$0xff] %v1730_v23  ;;  %v486_v26 = vmax.f32 %v460_v21, 0.0  ;;  %665 = vrot.lane.b32.xlu1 %v2158_v25, %s1874_s24  ;;  %663 = vrot.lane.b32.xlu0 %v2160_v22, %s1874_s24 }
 0x34b   :  { %v462_v27 = vpop.f32.mrf.mxu0 }
 0x34c   :  { %v1731_v28 = vpack.c.bf16 %v486_v26, %v485_v24  ;;  %v487_v29 = vmax.f32 %v462_v27, 0.0 }
 0x34d   :  { %v464_v30 = vpop.f32.mrf.mxu0 }
 0x34e   :  { %561 = vst [vmem:[#allocation2 + $0x44] sm:$0xff] %v1731_v28  ;;  %v488_v32 = vmax.f32 %v464_v30, 0.0  ;;  %1316 = vrot.lane.b32.xlu1 %v1862_v19, %s1874_s24  ;;  %661 = vrot.lane.b32.xlu0 %v2166_v31, %s1874_s24  ;;  %v1866_v48 = vpack.c.bf16 %v487_v29, %v485_v24 }
 0x34f   :  { %v2168_v33 = vpop.f32.mrf.mxu0 }
 0x350   :  { %v1732_v35 = vpack.c.bf16 %v488_v32, %v487_v29  ;;  %v489_v36 = vmax.f32 %v2168_v33, 0.0  ;;  %v1865_v47 = vpack.c.bf16 %v488_v32, %v486_v26 }
 0x351   :  { %v470_v37 = vpop.f32.mrf.mxu0  ;;  %v2192_v45 = vld [vmem:[#allocation2 + $0x28] ss:$16 sps:$4 sm:$0xff]   ;;  %v2194_v1 = vld [vmem:[#allocation2 + $0x24] ss:$16 sps:$4 sm:$0xff]  }
 0x352   :  { %562 = vst [vmem:[#allocation2 + $0x54] sm:$0xff] %v1732_v35  ;;  %v490_v38 = vmax.f32 %v470_v37, 0.0  ;;  %938 = vrot.lane.b32.xlu1 %v2160_v22, %s1876_s25  ;;  %1318 = vrot.lane.b32.xlu0 %v1861_v18, %s1874_s24  ;;  %v2306_v18 = vpop.permute.xlu1 %1326 }
 0x353   :  { %v2174_v39 = vpop.f32.mrf.mxu0 }
 0x354   :  { %v1733_v40 = vpack.c.bf16 %v490_v38, %v489_v36  ;;  %v491_v41 = vmax.f32 %v2174_v39, 0.0 }
 0x355   :  { %v474_v4 = vpop.f32.mrf.mxu0 }
 0x356   :  { %563 = vst [vmem:[#allocation2 + $0x64] sm:$0xff] %v1733_v40  ;;  %v492_v42 = vmax.f32 %v474_v4, 0.0  ;;  %936 = vrot.lane.b32.xlu1 %v2166_v31, %s1876_s25  ;;  %940 = vrot.lane.b32.xlu0 %v2158_v25, %s1876_s25  ;;  %v1868_v63 = vpack.c.bf16 %v491_v41, %v489_v36  ;;  %v1321_v19 = vpop.permute.xlu1 %1320 }
 0x358   :  { %v1734_v43 = vpack.c.bf16 %v492_v42, %v491_v41  ;;  %v1867_v3 = vpack.c.bf16 %v492_v42, %v490_v38 }
 0x359   :  { %v2214_v49 = vld [vmem:[#allocation2 + $0x48] ss:$16 sps:$4 sm:$0xff]   ;;  %v2225_v52 = vld [vmem:[#allocation2 + $0x44] ss:$16 sps:$4 sm:$0xff]  }
 0x35a   :  { %564 = vst [vmem:[#allocation2 + $0x74] sm:$0xff] %v1734_v43  ;;  %910 = vrot.lane.b32.xlu1 %v1863_v44, %s1874_s24  ;;  %908 = vrot.lane.b32.xlu0 %v1864_v13, %s1874_s24  ;;  %v834_v56 = vsel %vm825_vm9, %v2214_v49, 0  ;;  %v833_v59 = vsel %vm824_vm14, %v2225_v52, 0 }
 0x35e   :  { %766 = vrot.lane.b32.xlu1 %v1863_v44, %s1879_s28  ;;  %764 = vrot.lane.b32.xlu0 %v1864_v13, %s1879_s28 }
 0x361   :  { %v1848_v60 = vld [vmem:[#allocation2 + $0x68] ss:$16 sps:$4 sm:$0xff]   ;;  %v1849_v5 = vld [vmem:[#allocation2 + $0x64] ss:$16 sps:$4 sm:$0xff]  }
 0x362   :  { %671 = vrot.lane.b32.xlu1 %v2192_v45, %s1874_s24  ;;  %669 = vrot.lane.b32.xlu0 %v2194_v1, %s1874_s24  ;;  %v837_v8 = vsel %vm825_vm9, %v1848_v60, 0  ;;  %v1393_v10 = vsel %vm1381_vm3, %v1849_v5, 0  ;;  %v836_v11 = vsel %vm824_vm14, %v1849_v5, 0  ;;  %v1394_v23 = vsel %vm1382_vm4, %v1848_v60, 0 }
 0x366   :  { %1322 = vrot.lane.b32.xlu1 %v1864_v13, %s1874_s24  ;;  %667 = vrot.lane.b32.xlu0 %v2200_v46, %s1874_s24 }
 0x36a   :  { %946 = vrot.lane.b32.xlu1 %v2192_v45, %s1876_s25  ;;  %1324 = vrot.lane.b32.xlu0 %v1863_v44, %s1874_s24 }
 0x36e   :  { %944 = vrot.lane.b32.xlu0 %v2194_v1, %s1876_s25  ;;  %914 = vrot.lane.b32.xlu1 %v1865_v47, %s1874_s24 }
 0x372   :  { %942 = vrot.lane.b32.xlu0 %v2200_v46, %s1876_s25  ;;  %770 = vrot.lane.b32.xlu1 %v1866_v48, %s1879_s28 }
 0x376   :  { %912 = vrot.lane.b32.xlu0 %v1866_v48, %s1874_s24  ;;  %677 = vrot.lane.b32.xlu1 %v2214_v49, %s1874_s24 }
 0x37a   :  { %772 = vrot.lane.b32.xlu0 %v1865_v47, %s1879_s28  ;;  %1328 = vrot.lane.b32.xlu1 %v1866_v48, %s1874_s24 }
 0x37e   :  { %950 = vrot.lane.b32.xlu1 %v2225_v52, %s1876_s25  ;;  %675 = vrot.lane.b32.xlu0 %v2225_v52, %s1874_s24 }
 0x382   :  { %948 = vrot.lane.b32.xlu1 %v2233_v53, %s1876_s25  ;;  %673 = vrot.lane.b32.xlu0 %v2233_v53, %s1874_s24 }
 0x386   :  { %1165 = vrot.lane.b32.xlu1 %v834_v56, %s1869_s17  ;;  %1330 = vrot.lane.b32.xlu0 %v1865_v47, %s1874_s24 }
 0x38a   :  { %952 = vrot.lane.b32.xlu0 %v2214_v49, %s1876_s25  ;;  %918 = vrot.lane.b32.xlu1 %v1867_v3, %s1874_s24 }
 0x38e   :  { %1163 = vrot.lane.b32.xlu0 %v833_v59, %s1869_s17  ;;  %778 = vrot.lane.b32.xlu1 %v1867_v3, %s1879_s28 }
 0x392   :  { %1161 = vrot.lane.b32.xlu0 %v832_v62, %s1869_s17  ;;  %683 = vrot.lane.b32.xlu1 %v1848_v60, %s1874_s24 }
 0x396   :  { %916 = vrot.lane.b32.xlu0 %v1868_v63, %s1874_s24  ;;  %1334 = vrot.lane.b32.xlu1 %v1868_v63, %s1874_s24 }
 0x39a   :  { %776 = vrot.lane.b32.xlu0 %v1868_v63, %s1879_s28  ;;  %958 = vrot.lane.b32.xlu1 %v1848_v60, %s1876_s25 }
 0x39e   :  { %1171 = vrot.lane.b32.xlu1 %v837_v8, %s1869_s17  ;;  %681 = vrot.lane.b32.xlu0 %v1849_v5, %s1874_s24 }
 0x3a2   :  { %1487 = vrot.lane.b32.xlu1 %v1393_v10, %s1870_s20  ;;  %679 = vrot.lane.b32.xlu0 %v1851_v9, %s1874_s24 }
 0x3a6   :  { %1336 = vrot.lane.b32.xlu0 %v1867_v3, %s1874_s24  ;;  %1485 = vrot.lane.b32.xlu1 %v1392_v16, %s1870_s20 }
 0x3aa   :  { %956 = vrot.lane.b32.xlu0 %v1849_v5, %s1876_s25 }
 0x3ae   :  { %954 = vrot.lane.b32.xlu0 %v1851_v9, %s1876_s25 }
 0x3b2   :  { %1169 = vrot.lane.b32.xlu0 %v836_v11, %s1869_s17  ;;  %v905_v20 = vpop.permute.xlu0 %904 }
 0x3b3   :  { %960 = vrot.lane.b32.xlu1 %v905_v20, %s1876_s25 }
 0x3b4   :  { %v907_v34 = vpop.permute.xlu1 %906 }
 0x3b5   :  { %v920_v26 = vsel %vm90_vm5, %v905_v20, %v907_v34 }
 0x3b6   :  { %1167 = vrot.lane.b32.xlu0 %v835_v15, %s1869_s17  ;;  %v761_v17 = vpop.permute.xlu0 %760 }
 0x3b7   :  { %v2336_v30 = vsel %vm782_vm7, %v761_v17, %v2227_v61 }
 0x3b8   :  { %v2318_v12 = vpop.permute.xlu1 %758 }
 0x3b9   :  { %984 = vrot.lane.b32.xlu1 %v2318_v12, %s1876_s25  ;;  %v2330_v29 = vsel %vm782_vm7, %v2318_v12, %v761_v17  ;;  %v1407_v57 = vsel %vm1380_vm10, %v2318_v12, 0 }
 0x3ba   :  { %1489 = vrot.lane.b32.xlu0 %v1394_v23, %s1870_s20  ;;  %v1408_v58 = vsel %vm1381_vm3, %v2330_v29, 0 }
 0x3bc   :  { %v666_v24 = vpop.permute.xlu1 %665  ;;  %v664_v21 = vpop.permute.xlu0 %663 }
 0x3bd   :  { %962 = vrot.lane.b32.xlu1 %v920_v26, %s1876_s25  ;;  %v687_v32 = vsel %vm90_vm5, %v664_v21, %v666_v24  ;;  %v840_v36 = vsel %vm825_vm9, %v666_v24, 0 }
 0x3be   :  { %964 = vrot.lane.b32.xlu0 %v907_v34, %s1876_s25  ;;  %v839_v37 = vsel %vm824_vm14, %v687_v32, 0 }
 0x3c0   :  { %v1317_v27 = vpop.permute.xlu1 %1316  ;;  %v662_v28 = vpop.permute.xlu0 %661 }
 0x3c1   :  { %986 = vrot.lane.b32.xlu1 %v2330_v29, %s1876_s25  ;;  %v686_v38 = vsel %vm90_vm5, %v662_v28, %v664_v21  ;;  %v1395_v41 = vsel %vm1380_vm10, %v1317_v27, 0 }
 0x3c2   :  { %988 = vrot.lane.b32.xlu0 %v2336_v30, %s1876_s25  ;;  %v838_v4 = vsel %vm823_vm15, %v686_v38, 0 }
 0x3c4   :  { %v2341_v33 = vpop.permute.xlu1 %938  ;;  %v1319_v35 = vpop.permute.xlu0 %1318 }
 0x3c5   :  { %1177 = vrot.lane.b32.xlu1 %v840_v36, %s1869_s17  ;;  %v1340_v42 = vsel %vm90_vm5, %v1317_v27, %v1319_v35  ;;  %v1341_v43 = vsel %vm90_vm5, %v1319_v35, %v1321_v19 }
 0x3c6   :  { %1175 = vrot.lane.b32.xlu0 %v839_v37, %s1869_s17  ;;  %v1396_v47 = vsel %vm1381_vm3, %v1340_v42, 0  ;;  %v1397_v48 = vsel %vm1382_vm4, %v1341_v43, 0 }
 0x3c8   :  { %v2350_v39 = vpop.permute.xlu1 %936  ;;  %v2352_v40 = vpop.permute.xlu0 %940 }
 0x3c9   :  { %1491 = vrot.lane.b32.xlu1 %v1395_v41, %s1870_s20 }
 0x3ca   :  { %1173 = vrot.lane.b32.xlu0 %v838_v4, %s1869_s17 }
 0x3cc   :  { %v911_v44 = vpop.permute.xlu1 %910  ;;  %v909_v13 = vpop.permute.xlu0 %908 }
 0x3cd   :  { %1493 = vrot.lane.b32.xlu1 %v1396_v47, %s1870_s20  ;;  %v921_v8 = vsel %vm90_vm5, %v909_v13, %v911_v44 }
 0x3ce   :  { %1495 = vrot.lane.b32.xlu0 %v1397_v48, %s1870_s20 }
 0x3d0   :  { %v767_v61 = vpop.permute.xlu1 %766  ;;  %v2368_v56 = vpop.permute.xlu0 %764 }
 0x3d1   :  { %970 = vrot.lane.b32.xlu1 %v911_v44, %s1876_s25  ;;  %v2374_v60 = vsel %vm782_vm7, %v767_v61, %v2235_v54  ;;  %v2393_v19 = vsel %vm782_vm7, %v2368_v56, %v767_v61 }
 0x3d2   :  { %966 = vrot.lane.b32.xlu0 %v909_v13, %s1876_s25 }
 0x3d4   :  { %v672_v3 = vpop.permute.xlu1 %671  ;;  %v670_v59 = vpop.permute.xlu0 %669 }
 0x3d5   :  { %994 = vrot.lane.b32.xlu1 %v2374_v60, %s1876_s25  ;;  %v843_v5 = vsel %vm825_vm9, %v672_v3, 0  ;;  %v689_v11 = vsel %vm90_vm5, %v670_v59, %v672_v3 }
 0x3d6   :  { %990 = vrot.lane.b32.xlu0 %v2368_v56, %s1876_s25  ;;  %v842_v17 = vsel %vm824_vm14, %v689_v11, 0 }
 0x3d8   :  { %v1323_v62 = vpop.permute.xlu1 %1322  ;;  %v668_v63 = vpop.permute.xlu0 %667 }
 0x3d9   :  { %1183 = vrot.lane.b32.xlu1 %v843_v5, %s1869_s17  ;;  %v1398_v10 = vsel %vm1380_vm10, %v1323_v62, 0  ;;  %v688_v23 = vsel %vm90_vm5, %v668_v63, %v670_v59 }
 0x3da   :  { %968 = vrot.lane.b32.xlu0 %v921_v8, %s1876_s25  ;;  %v841_v26 = vsel %vm823_vm15, %v688_v23, 0 }
 0x3dc   :  { %v2385_v9 = vpop.permute.xlu1 %946  ;;  %v1325_v54 = vpop.permute.xlu0 %1324 }
 0x3dd   :  { %v1342_v16 = vsel %vm90_vm5, %v1323_v62, %v1325_v54  ;;  %1497 = vrot.lane.b32.xlu1 %v1398_v10, %s1870_s20  ;;  %v1343_v27 = vsel %vm90_vm5, %v1325_v54, %v2306_v18 }
 0x3de   :  { %992 = vrot.lane.b32.xlu0 %v2393_v19, %s1876_s25  ;;  %v1399_v15 = vsel %vm1381_vm3, %v1342_v16, 0  ;;  %v1400_v35 = vsel %vm1382_vm4, %v1343_v27, 0 }
 0x3e0   :  { %v2398_v34 = vpop.permute.xlu0 %944  ;;  %v915_v20 = vpop.permute.xlu1 %914 }
 0x3e1   :  { %1499 = vrot.lane.b32.xlu1 %v1399_v15, %s1870_s20 }
 0x3e2   :  { %1181 = vrot.lane.b32.xlu0 %v842_v17, %s1869_s17 }
 0x3e4   :  { %v2407_v24 = vpop.permute.xlu0 %942  ;;  %v2409_v21 = vpop.permute.xlu1 %770 }
 0x3e6   :  { %1179 = vrot.lane.b32.xlu0 %v841_v26, %s1869_s17 }
 0x3e8   :  { %v913_v28 = vpop.permute.xlu0 %912  ;;  %v678_v32 = vpop.permute.xlu1 %677 }
 0x3e9   :  { %972 = vrot.lane.b32.xlu1 %v913_v28, %s1876_s25  ;;  %v922_v41 = vsel %vm90_vm5, %v913_v28, %v915_v20  ;;  %v846_v3 = vsel %vm825_vm9, %v678_v32, 0 }
 0x3ea   :  { %1501 = vrot.lane.b32.xlu0 %v1400_v35, %s1870_s20 }
 0x3ec   :  { %v773_v36 = vpop.permute.xlu0 %772  ;;  %v1329_v37 = vpop.permute.xlu1 %1328 }
 0x3ed   :  { %996 = vrot.lane.b32.xlu1 %v2409_v21, %s1876_s25  ;;  %v2429_v4 = vsel %vm782_vm7, %v773_v36, %v2219_v50  ;;  %v2438_v13 = vsel %vm782_vm7, %v2409_v21, %v773_v36  ;;  %v1401_v8 = vsel %vm1380_vm10, %v1329_v37, 0 }
 0x3ee   :  { %976 = vrot.lane.b32.xlu0 %v915_v20, %s1876_s25 }
 0x3f0   :  { %v2423_v38 = vpop.permute.xlu1 %950  ;;  %v676_v18 = vpop.permute.xlu0 %675 }
 0x3f1   :  { %974 = vrot.lane.b32.xlu1 %v922_v41, %s1876_s25  ;;  %v691_v42 = vsel %vm90_vm5, %v676_v18, %v678_v32  ;;  %v1390_v32 = vsel %vm1381_vm3, %v2225_v52, 0  ;;  %v830_v52 = vsel %vm824_vm14, %v2194_v1, 0 }
 0x3f2   :  { %1000 = vrot.lane.b32.xlu0 %v2429_v4, %s1876_s25  ;;  %v845_v47 = vsel %vm824_vm14, %v691_v42, 0 }
 0x3f4   :  { %v2434_v43 = vpop.permute.xlu1 %948  ;;  %v674_v44 = vpop.permute.xlu0 %673 }
 0x3f5   :  { %998 = vrot.lane.b32.xlu1 %v2438_v13, %s1876_s25  ;;  %v690_v50 = vsel %vm90_vm5, %v674_v44, %v676_v18  ;;  %v1389_v18 = vsel %vm1380_vm10, %v2233_v53, 0  ;;  %v829_v53 = vsel %vm823_vm15, %v2200_v46, 0 }
 0x3f6   :  { %1187 = vrot.lane.b32.xlu0 %v845_v47, %s1869_s17  ;;  %v844_v59 = vsel %vm823_vm15, %v690_v50, 0 }
 0x3f8   :  { %v2446_v48 = vpop.permute.xlu1 %1165  ;;  %v1331_v61 = vpop.permute.xlu0 %1330 }
 0x3f9   :  { %1189 = vrot.lane.b32.xlu1 %v846_v3, %s1869_s17  ;;  %v1345_v62 = vsel %vm90_vm5, %v1331_v61, %v2299_v14  ;;  %v1344_v54 = vsel %vm90_vm5, %v1329_v37, %v1331_v61  ;;  %v1391_v37 = vsel %vm1382_vm4, %v2214_v49, 0  ;;  %v831_v49 = vsel %vm825_vm9, %v2192_v45, 0 }
 0x3fa   :  { %1185 = vrot.lane.b32.xlu0 %v844_v59, %s1869_s17  ;;  %v1403_v10 = vsel %vm1382_vm4, %v1345_v62, 0  ;;  %v1402_v11 = vsel %vm1381_vm3, %v1344_v54, 0  ;;  %v1387_v61 = vsel %vm1381_vm3, %v2194_v1, 0  ;;  %v1388_v59 = vsel %vm1382_vm4, %v2192_v45, 0 }
 0x3fb   :  { %v1386_v62 = vsel %vm1380_vm10, %v2200_v46, 0  ;;  %v827_v1 = vsel %vm824_vm14, %v2160_v22, 0  ;;  %v828_v45 = vsel %vm825_vm9, %v2158_v25, 0 }
 0x3fc   :  { %v2456_v63 = vpop.permute.xlu0 %952  ;;  %v919_v5 = vpop.permute.xlu1 %918 }
 0x3fd   :  { %1503 = vrot.lane.b32.xlu1 %v1401_v8, %s1870_s20 }
 0x3fe   :  { %1507 = vrot.lane.b32.xlu0 %v1403_v10, %s1870_s20  ;;  %v826_v10 = vsel %vm823_vm15, %v2166_v31, 0 }
 0x400   :  { %v2465_v16 = vpop.permute.xlu0 %1163  ;;  %v2467_v14 = vpop.permute.xlu1 %778 }
 0x401   :  { %1505 = vrot.lane.b32.xlu1 %v1402_v11, %s1870_s20  ;;  %v1384_v11 = vsel %vm1381_vm3, %v2160_v22, 0  ;;  %v2564_v22 = vsel %vm782_vm7, %v2467_v14, %v2223_v51 }
 0x402   :  { %982 = vrot.lane.b32.xlu0 %v919_v5, %s1876_s25 }
 0x404   :  { %v2473_v20 = vpop.permute.xlu0 %1161  ;;  %v2475_v15 = vpop.permute.xlu1 %683 }
 0x408   :  { %v917_v17 = vpop.permute.xlu0 %916  ;;  %v2477_v23 = vpop.permute.xlu1 %1334 }
 0x409   :  { %978 = vrot.lane.b32.xlu0 %v917_v17, %s1876_s25  ;;  %v923_v26 = vsel %vm90_vm5, %v917_v17, %v919_v5 }
 0x40a   :  { %980 = vrot.lane.b32.xlu1 %v923_v26, %s1876_s25 }
 0x40c   :  { %v2482_v27 = vpop.permute.xlu0 %776  ;;  %v959_v28 = vpop.permute.xlu1 %958 }
 0x40d   :  { %1002 = vrot.lane.b32.xlu0 %v2482_v27, %s1876_s25 }
 0x40e   :  { %1481 = vrot.lane.b32.xlu1 %v1390_v32, %s1870_s20  ;;  %v1385_v32 = vsel %vm1382_vm4, %v2158_v25, 0  ;;  %v1383_v25 = vsel %vm1380_vm10, %v2166_v31, 0  ;;  %v849_v31 = vsel %vm825_vm9, %v2475_v15, 0 }
 0x410   :  { %v1172_v35 = vpop.permute.xlu1 %1171  ;;  %v2490_v36 = vpop.permute.xlu0 %681 }
 0x411   :  { %1483 = vrot.lane.b32.xlu0 %v1391_v37, %s1870_s20 }
 0x412   :  { %1479 = vrot.lane.b32.xlu1 %v1389_v18, %s1870_s20 }
 0x414   :  { %v1488_v41 = vpop.permute.xlu1 %1487  ;;  %v680_v42 = vpop.permute.xlu0 %679 }
 0x415   :  { %1157 = vrot.lane.b32.xlu0 %v830_v52, %s1869_s17  ;;  %v2571_v52 = vsel %vm782_vm7, %v2482_v27, %v2467_v14 }
 0x416   :  { %1159 = vrot.lane.b32.xlu1 %v831_v49, %s1869_s17 }
 0x418   :  { %v2508_v44 = vpop.permute.xlu0 %1336  ;;  %v1486_v47 = vpop.permute.xlu1 %1485 }
 0x419   :  { %v2514_v50 = vsel %vm111_vm6, %v1486_v47, %v1488_v41  ;;  %1155 = vrot.lane.b32.xlu0 %v829_v53, %s1869_s17  ;;  %v859_v53 = vsel %vm823_vm15, %v2482_v27, 0 }
 0x41a   :  { %1475 = vrot.lane.b32.xlu1 %v1387_v61, %s1870_s20  ;;  %v693_v61 = vsel %vm90_vm5, %v2490_v36, %v2475_v15  ;;  %v692_v15 = vsel %vm90_vm5, %v680_v42, %v2490_v36  ;;  %v1347_v42 = vsel %vm90_vm5, %v2508_v44, %v2283_v6  ;;  %v1416_v6 = vsel %vm1380_vm10, %v2482_v27, 0 }
 0x41c   :  { %v957_v3 = vpop.permute.xlu0 %956 }
 0x41d   :  { %1477 = vrot.lane.b32.xlu0 %v1388_v59, %s1870_s20  ;;  %v2529_v5 = vsel %vm146_vm13, %v957_v3, %v959_v28 }
 0x41e   :  { %1473 = vrot.lane.b32.xlu1 %v1386_v62, %s1870_s20 }
 0x420   :  { %v955_v8 = vpop.permute.xlu0 %954 }
 0x421   :  { %1151 = vrot.lane.b32.xlu0 %v827_v1, %s1869_s17  ;;  %v2540_v54 = vsel %vm146_vm13, %v955_v8, %v957_v3  ;;  %v1854_v3 = vld [vmem:[%s2980_s2 + $0x14] ss:$8 sps:$4 sm:$0xff]   ;;  %v848_v8 = vsel %vm824_vm14, %v693_v61, 0  ;;  %v858_v61 = vsel %vm825_vm9, %v2429_v4, 0 }
 0x422   :  { %1153 = vrot.lane.b32.xlu1 %v828_v45, %s1869_s17  ;;  %1718 = vmatprep.mubr.msk.bf16.mxu1 %vm1057_vm8, %v1854_v3  ;;  %v1404_v45 = vsel %vm1380_vm10, %v2477_v23, 0 }
 0x424   :  { %v1170_v46 = vpop.permute.xlu0 %1169 }
 0x425   :  { %1149 = vrot.lane.b32.xlu0 %v826_v10, %s1869_s17  ;;  %v2551_v17 = vsel %vm52_vm0, %v1170_v46, %v1172_v35  ;;  %v961_v26 = vpop.permute.xlu1 %960  ;;  %v1346_v10 = vsel %vm90_vm5, %v2477_v23, %v2508_v44 }
 0x426   :  { %1469 = vrot.lane.b32.xlu1 %v1384_v11, %s1870_s20 }
 0x428   :  { %v1168_v28 = vpop.permute.xlu0 %1167 }
 0x429   :  { %v2558_v37 = vsel %vm52_vm0, %v1168_v28, %v1170_v46  ;;  %1471 = vrot.lane.b32.xlu0 %v1385_v32, %s1870_s20  ;;  %v1405_v28 = vsel %vm1381_vm3, %v1346_v10, 0  ;;  %v1413_v10 = vsel %vm1380_vm10, %v2409_v21, 0 }
 0x42a   :  { %1006 = vrot.lane.b32.xlu1 %v2564_v22, %s1876_s25 }
 0x42b   :  { %v985_v35 = vpop.permute.xlu1 %984 }
 0x42c   :  { %v1490_v18 = vpop.permute.xlu0 %1489 }
 0x42d   :  { %1004 = vrot.lane.b32.xlu0 %v2571_v52, %s1876_s25  ;;  %v2579_v51 = vsel %vm111_vm6, %v1488_v41, %v1490_v18  ;;  %v1406_v18 = vsel %vm1382_vm4, %v1347_v42, 0 }
 0x42e   :  { %1467 = vrot.lane.b32.xlu1 %v1383_v25, %s1870_s20 }
 0x42f   :  { %v963_v49 = vpop.permute.xlu1 %962 }
 0x430   :  { %v965_v47 = vpop.permute.xlu0 %964  ;;  %v2586_v14 = vsel %vm146_vm13, %v961_v26, %v963_v49  ;;  %v847_v26 = vsel %vm823_vm15, %v692_v15, 0 }
 0x431   :  { %1215 = vrot.lane.b32.xlu0 %v859_v53, %s1869_s17  ;;  %v2596_v41 = vsel %vm146_vm13, %v963_v49, %v965_v47  ;;  %v857_v53 = vsel %vm824_vm14, %v2438_v13, 0 }
 0x432   :  { %1195 = vrot.lane.b32.xlu1 %v849_v31, %s1869_s17 }
 0x433   :  { %v987_v59 = vpop.permute.xlu1 %986 }
 0x434   :  { %v989_v62 = vpop.permute.xlu0 %988  ;;  %v2606_v1 = vsel %vm146_vm13, %v985_v35, %v987_v59 }
 0x435   :  { %1193 = vrot.lane.b32.xlu0 %v848_v8, %s1869_s17  ;;  %v2615_v46 = vsel %vm146_vm13, %v987_v59, %v989_v62  ;;  %v856_v59 = vsel %vm823_vm15, %v2409_v21, 0  ;;  %v1414_v62 = vsel %vm1381_vm3, %v2438_v13, 0  ;;  %v854_v13 = vsel %vm824_vm14, %v2393_v19, 0 }
 0x436   :  { %1509 = vrot.lane.b32.xlu1 %v1404_v45, %s1870_s20  ;;  %v1415_v45 = vsel %vm1382_vm4, %v2429_v4, 0  ;;  %v855_v4 = vsel %vm825_vm9, %v2374_v60, 0  ;;  %v853_v21 = vsel %vm823_vm15, %v2368_v56, 0 }
 0x437   :  { %v1178_v11 = vpop.permute.xlu1 %1177 }
 0x438   :  { %v1176_v36 = vpop.permute.xlu0 %1175 }
 0x439   :  { %1191 = vrot.lane.b32.xlu0 %v847_v26, %s1869_s17  ;;  %v2630_v32 = vsel %vm52_vm0, %v1176_v36, %v1178_v11 }
 0x43a   :  { %1511 = vrot.lane.b32.xlu1 %v1405_v28, %s1870_s20  ;;  %v1411_v28 = vsel %vm1381_vm3, %v2393_v19, 0  ;;  %v861_v19 = vsel %vm825_vm9, %v2564_v22, 0 }
 0x43b   :  { %v1492_v23 = vpop.permute.xlu1 %1491 }
 0x43c   :  { %v1174_v35 = vpop.permute.xlu0 %1173 }
 0x43d   :  { %v2636_v25 = vsel %vm52_vm0, %v1174_v35, %v1176_v36  ;;  %1513 = vrot.lane.b32.xlu0 %v1406_v18, %s1870_s20 }
 0x43e   :  { %1533 = vrot.lane.b32.xlu1 %v1416_v6, %s1870_s20 }
 0x43f   :  { %v1494_v44 = vpop.permute.xlu1 %1493 }
 0x440   :  { %v2644_v49 = vsel %vm111_vm6, %v1492_v23, %v1494_v44  ;;  %v1496_v47 = vpop.permute.xlu0 %1495 }
 0x441   :  { %1211 = vrot.lane.b32.xlu0 %v857_v53, %s1869_s17  ;;  %v2654_v31 = vsel %vm111_vm6, %v1494_v44, %v1496_v47  ;;  %v1412_v47 = vsel %vm1382_vm4, %v2374_v60, 0  ;;  %v1417_v60 = vsel %vm1381_vm3, %v2571_v52, 0 }
 0x442   :  { %1213 = vrot.lane.b32.xlu1 %v858_v61, %s1869_s17 }
 0x443   :  { %v2657_v27 = vpop.permute.xlu1 %970 }
 0x444   :  { %v2659_v3 = vpop.permute.xlu0 %966 }
 0x445   :  { %1209 = vrot.lane.b32.xlu0 %v856_v59, %s1869_s17  ;;  %v860_v59 = vsel %vm824_vm14, %v2571_v52, 0 }
 0x446   :  { %1529 = vrot.lane.b32.xlu1 %v1414_v62, %s1870_s20 }
 0x447   :  { %v995_v8 = vpop.permute.xlu1 %994 }
 0x448   :  { %v991_v15 = vpop.permute.xlu0 %990 }
 0x449   :  { %1531 = vrot.lane.b32.xlu0 %v1415_v45, %s1870_s20 }
 0x44a   :  { %1527 = vrot.lane.b32.xlu1 %v1413_v10, %s1870_s20  ;;  %v1418_v10 = vsel %vm1382_vm4, %v2564_v22, 0  ;;  %v851_v22 = vsel %vm824_vm14, %v2330_v29, 0  ;;  %v1639_v29 = vld [vmem:[%s2981_s3 + $0x8] sm:$0xff] }
 0x44b   :  { %v1184_v11 = vpop.permute.xlu1 %1183 }
 0x44c   :  { %v2677_v26 = vpop.permute.xlu0 %968 }
 0x44d   :  { %1205 = vrot.lane.b32.xlu0 %v854_v13, %s1869_s17 }
 0x44e   :  { %1207 = vrot.lane.b32.xlu1 %v855_v4, %s1869_s17 }
 0x44f   :  { %v1498_v36 = vpop.permute.xlu1 %1497 }
 0x450   :  { %v993_v42 = vpop.permute.xlu0 %992 }
 0x451   :  { %1203 = vrot.lane.b32.xlu0 %v853_v21, %s1869_s17  ;;  %v2695_v23 = vsel %vm146_vm13, %v993_v42, %v995_v8  ;;  %v2698_v35 = vsel %vm146_vm13, %v991_v15, %v993_v42  ;;  %v1857_v15 = vld [vmem:[%s2980_s2 + $0x4] ss:$8 sps:$4 sm:$0xff]   ;;  %v850_v21 = vsel %vm823_vm15, %v2318_v12, 0 }
 0x452   :  { %1523 = vrot.lane.b32.xlu1 %v1411_v28, %s1870_s20  ;;  %1721 = vmatprep.mubr.msk.bf16.mxu0 %vm1057_vm8, %v1857_v15 }
 0x453   :  { %v1500_v18 = vpop.permute.xlu1 %1499 }
 0x454   :  { %v2702_v6 = vsel %vm111_vm6, %v1498_v36, %v1500_v18  ;;  %v1182_v44 = vpop.permute.xlu0 %1181 }
 0x455   :  { %1525 = vrot.lane.b32.xlu0 %v1412_v47, %s1870_s20  ;;  %v2712_v53 = vsel %vm52_vm0, %v1182_v44, %v1184_v11  ;;  %v1410_v11 = vsel %vm1380_vm10, %v2368_v56, 0  ;;  %v852_v56 = vsel %vm825_vm9, %v2336_v30, 0 }
 0x456   :  { %1219 = vrot.lane.b32.xlu1 %v861_v19, %s1869_s17 }
 0x458   :  { %v1180_v61 = vpop.permute.xlu0 %1179 }
 0x459   :  { %v2719_v62 = vsel %vm52_vm0, %v1180_v61, %v1182_v44  ;;  %1217 = vrot.lane.b32.xlu0 %v860_v59, %s1869_s17 }
 0x45a   :  { %1535 = vrot.lane.b32.xlu1 %v1417_v60, %s1870_s20 }
 0x45b   :  { %v973_v8 = vpop.permute.xlu1 %972 }
 0x45c   :  { %v1502_v45 = vpop.permute.xlu0 %1501 }
 0x45d   :  { %1537 = vrot.lane.b32.xlu0 %v1418_v10, %s1870_s20  ;;  %v2737_v52 = vsel %vm111_vm6, %v1500_v18, %v1502_v45  ;;  %v1409_v18 = vsel %vm1382_vm4, %v2336_v30, 0 }
 0x45e   :  { %1521 = vrot.lane.b32.xlu1 %v1410_v11, %s1870_s20 }
 0x45f   :  { %v2741_v13 = vpop.permute.xlu1 %996 }
 0x460   :  { %v977_v4 = vpop.permute.xlu0 %976 }
 0x461   :  { %1199 = vrot.lane.b32.xlu0 %v851_v22, %s1869_s17 }
 0x462   :  { %1201 = vrot.lane.b32.xlu1 %v852_v56, %s1869_s17 }
 0x463   :  { %v975_v36 = vpop.permute.xlu1 %974 }
 0x464   :  { %v2751_v42 = vpop.permute.xlu0 %1000  ;;  %v1022_v10 = vsel %vm146_vm13, %v975_v36, %v977_v4  ;;  %v1021_v22 = vsel %vm146_vm13, %v973_v8, %v975_v36  ;;  %v1019_v4 = vsel %vm146_vm13, %v2659_v3, %v2677_v26  ;;  %v1014_v3 = vsel %vm146_vm13, %v2423_v38, %v2456_v63 }
 0x465   :  { %1197 = vrot.lane.b32.xlu0 %v850_v21, %s1869_s17  ;;  %v1020_v21 = vsel %vm146_vm13, %v2677_v26, %v2657_v27  ;;  %v1011_v63 = vsel %vm146_vm13, %v2407_v24, %v2398_v34 }
 0x466   :  { %1517 = vrot.lane.b32.xlu1 %v1408_v58, %s1870_s20 }
 0x467   :  { %v2761_v28 = vpop.permute.xlu1 %998 }
 0x468   :  { %v2763_v55 = vpop.permute.xlu0 %1187 }
 0x469   :  { %1519 = vrot.lane.b32.xlu0 %v1409_v18, %s1870_s20 }
 0x46a   :  { %1515 = vrot.lane.b32.xlu1 %v1407_v57, %s1870_s20 }
 0x46b   :  { %v2779_v44 = vpop.permute.xlu1 %1189 }
 0x46c   :  { %v1186_v2 = vpop.permute.xlu0 %1185 }
 0x46d   :  { %v2783_v30 = vsel %vm52_vm0, %v1186_v2, %v2763_v55  ;;  %1642 = vperm.xlu0 %1826, %v1638_v7  }
 0x46e   :  { %1647 = vperm.xlu1 %1827, %v1639_v29  }
 0x46f   :  { %v2787_v12 = vpop.permute.xlu1 %1503 }
 0x470   :  { %v2785_v0 = vpop.permute.xlu0 %1507 }
 0x473   :  { %v2789_v19 = vpop.permute.xlu1 %1505 }
 0x474   :  { %v983_v47 = vpop.permute.xlu0 %982 }
 0x47b   :  { %v979_v61 = vpop.permute.xlu0 %978 }
 0x47c   :  { %v981_v59 = vpop.permute.xlu1 %980 }
 0x47d   :  { %v1024_v60 = vsel %vm146_vm13, %v981_v59, %v983_v47  ;;  %v1023_v15 = vsel %vm146_vm13, %v979_v61, %v981_v59 }
 0x47e   :  { %1061 = vmatprep.subr.bf16.mxu1 %v1024_v60 }
 0x47f   :  { %1062 = vmatpush1.bf16.msra.mxu1 %v1023_v15  ;;  %v1003_v45 = vpop.permute.xlu0 %1002 }
 0x480   :  { %v2794_v11 = vpop.permute.xlu1 %1481  ;;  %1063 = vmatprep.subr.bf16.mxu1 %v1022_v10 }
 0x483   :  { %1064 = vmatpush1.bf16.msra.mxu1 %v1021_v22  ;;  %v2797_v56 = vpop.permute.xlu0 %1483 }
 0x484   :  { %v1480_v58 = vpop.permute.xlu1 %1479  ;;  %1065 = vmatprep.subr.bf16.mxu1 %v1020_v21 }
 0x485   :  { %v2804_v18 = vsel %vm111_vm6, %v1480_v58, %v2794_v11 }
 0x487   :  { %1066 = vmatpush1.bf16.msra.mxu1 %v1019_v4  ;;  %v2809_v57 = vpop.permute.xlu0 %1157 }
 0x488   :  { %v2811_v8 = vpop.permute.xlu1 %1159  ;;  %1067 = vmatprep.subr.bf16.mxu1 %v2596_v41 }
 0x48b   :  { %1068 = vmatpush1.bf16.msra.mxu1 %v2586_v14  ;;  %v2815_v27 = vpop.permute.xlu0 %1155  ;;  %v1013_v14 = vsel %vm146_vm13, %v2434_v43, %v2423_v38  ;;  %v1010_v38 = vsel %vm146_vm13, %v2341_v33, %v2352_v40  ;;  %v1030_v40 = vsel %vm146_vm13, %v2761_v28, %v2751_v42 }
 0x48c   :  { %v2817_v36 = vpop.permute.xlu1 %1475  ;;  %1069 = vmatprep.subr.bf16.mxu1 %v2529_v5  ;;  %v1012_v5 = vsel %vm146_vm13, %v2398_v34, %v2385_v9  ;;  %v1009_v9 = vsel %vm146_vm13, %v2350_v39, %v2341_v33  ;;  %v1029_v39 = vsel %vm146_vm13, %v2741_v13, %v2761_v28  ;;  %v1235_v13 = vsel %vm52_vm0, %v2763_v55, %v2779_v44 }
 0x48f   :  { %1070 = vmatpush1.bf16.msra.mxu1 %v2540_v54  ;;  %v2821_v7 = vpop.permute.xlu0 %1477 }
 0x490   :  { %v2826_v26 = vpop.permute.xlu1 %1473  ;;  %1071 = vmatprep.subr.bf16.mxu1 %v1014_v3 }
 0x493   :  { %1072 = vmatpush1.bf16.msra.mxu1 %v1013_v14  ;;  %v2831_v41 = vpop.permute.xlu0 %1151 }
 0x494   :  { %v2836_v54 = vpop.permute.xlu1 %1153  ;;  %1073 = vmatprep.subr.bf16.mxu1 %v1012_v5 }
 0x497   :  { %1074 = vmatpush1.bf16.msra.mxu1 %v1011_v63  ;;  %v2841_v29 = vpop.permute.xlu0 %1149 }
 0x498   :  { %v2846_v43 = vpop.permute.xlu1 %1469  ;;  %1075 = vmatprep.subr.bf16.mxu1 %v1010_v38 }
 0x49b   :  { %1076 = vmatpush1.bf16.msra.mxu1 %v1009_v9  ;;  %v2851_v2 = vpop.permute.xlu0 %1471 }
 0x49c   :  { %v1007_v47 = vpop.permute.xlu1 %1006 }
 0x49f   :  { %v1005_v61 = vpop.permute.xlu0 %1004 }
 0x4a0   :  { %v2853_v34 = vpop.permute.xlu1 %1467  ;;  %v1032_v24 = vsel %vm146_vm13, %v1005_v61, %v1007_v47  ;;  %v1031_v59 = vsel %vm146_vm13, %v1003_v45, %v1005_v61 }
 0x4a1   :  { %1085 = vmatprep.subr.bf16.mxu1 %v1032_v24 }
 0x4a2   :  { %1086 = vmatpush2.bf16.msra.mxu1 %v1031_v59  ;;  %v1855_v59 = vld [vmem:[%s2980_s2] ss:$8 sps:$4 sm:$0xff]  }
 0x4a3   :  { %1087 = vmatprep.subr.bf16.mxu1 %v1030_v40  ;;  %v2860_v60 = vpop.permute.xlu0 %1215 }
 0x4a4   :  { %v1196_v33 = vpop.permute.xlu1 %1195 }
 0x4a6   :  { %1088 = vmatpush2.bf16.msra.mxu1 %v1029_v39 }
 0x4a7   :  { %1089 = vmatprep.subr.bf16.mxu1 %v2695_v23  ;;  %v1194_v15 = vpop.permute.xlu0 %1193  ;;  %v1852_v23 = vld [vmem:[%s2980_s2 + $0x10] ss:$8 sps:$4 sm:$0xff]  }
 0x4a8   :  { %v1510_v10 = vpop.permute.xlu1 %1509  ;;  %v1237_v45 = vsel %vm52_vm0, %v1194_v15, %v1196_v33 }
 0x4a9   :  { %1273 = vmatprep.subr.bf16.mxu0 %v1237_v45 }
 0x4aa   :  { %1090 = vmatpush2.bf16.msra.mxu1 %v2698_v35 }
 0x4ab   :  { %1091 = vmatprep.subr.bf16.mxu1 %v2615_v46  ;;  %v1192_v42 = vpop.permute.xlu0 %1191  ;;  %v1858_v46 = vld [vmem:[%s2980_s2 + $0x24] ss:$8 sps:$4 sm:$0xff]  }
 0x4ac   :  { %v1236_v22 = vsel %vm52_vm0, %v1192_v42, %v1194_v15  ;;  %v1512_v21 = vpop.permute.xlu1 %1511 }
 0x4ad   :  { %1274 = vmatpush1.bf16.msra.mxu0 %v1236_v22  ;;  %v1554_v55 = vsel %vm111_vm6, %v1510_v10, %v1512_v21  ;;  %v1860_v10 = vld [vmem:[%s2980_s2 + $0x20] ss:$8 sps:$4 sm:$0xff]  }
 0x4ae   :  { %1092 = vmatpush2.bf16.msra.mxu1 %v2606_v1  ;;  %1275 = vmatprep.subr.bf16.mxu0 %v1235_v13  ;;  %v1553_v1 = vsel %vm111_vm6, %v2789_v19, %v2785_v0 }
 0x4af   :  { %v1514_v28 = vpop.permute.xlu0 %1513 }
 0x4b0   :  { %v2880_v35 = vpop.permute.xlu1 %1533  ;;  %v1555_v58 = vsel %vm111_vm6, %v1512_v21, %v1514_v28 }
 0x4b1   :  { %1094 = vmatmul.mubr.bf16.vlgmr.msra.gmra.mxu1 %v1852_v23  ;;  %1276 = vmatpush1.bf16.msra.mxu0 %v2783_v30  ;;  %v1552_v30 = vsel %vm111_vm6, %v2787_v12, %v2789_v19  ;;  %v1542_v19 = vsel %vm111_vm6, %v2826_v26, %v2817_v36 }
 0x4b2   :  { %1591 = vmatprep.subr.bf16.mxu1 %v1555_v58  ;;  %1277 = vmatprep.subr.bf16.mxu0 %v2712_v53 }
 0x4b3   :  { %1592 = vmatpush1.bf16.msra.mxu1 %v1554_v55  ;;  %v1212_v44 = vpop.permute.xlu0 %1211  ;;  %1726 = vmatprep.mubr.msk.bf16.mxu1 %vm1057_vm8, %v1858_v46 }
 0x4b4   :  { %1593 = vmatprep.subr.bf16.mxu1 %v1553_v1  ;;  %v1214_v4 = vpop.permute.xlu1 %1213 }
 0x4b5   :  { %1278 = vmatpush1.bf16.msra.mxu0 %v2719_v62 }
 0x4b6   :  { %1279 = vmatprep.subr.bf16.mxu0 %v2630_v32  ;;  %v1227_v32 = vsel %vm52_vm0, %v2465_v16, %v2446_v48  ;;  %v1545_v48 = vsel %vm111_vm6, %v2794_v11, %v2797_v56  ;;  %v1541_v11 = vsel %vm111_vm6, %v2846_v43, %v2851_v2 }
 0x4b7   :  { %1594 = vmatpush1.bf16.msra.mxu1 %v1552_v30  ;;  %v1210_v53 = vpop.permute.xlu0 %1209 }
 0x4b8   :  { %1595 = vmatprep.subr.bf16.mxu1 %v2737_v52  ;;  %v2896_v3 = vpop.permute.xlu1 %1529 }
 0x4b9   :  { %1280 = vmatpush1.bf16.msra.mxu0 %v2636_v25 }
 0x4ba   :  { %1281 = vmatprep.subr.bf16.mxu0 %v2551_v17  ;;  %v1226_v17 = vsel %vm52_vm0, %v2473_v20, %v2465_v16  ;;  %v1224_v16 = vsel %vm52_vm0, %v2815_v27, %v2809_v57  ;;  %v1540_v27 = vsel %vm111_vm6, %v2853_v34, %v2846_v43 }
 0x4bb   :  { %1596 = vmatpush1.bf16.msra.mxu1 %v2702_v6  ;;  %v1532_v0 = vpop.permute.xlu0 %1531  ;;  %v1222_v6 = vsel %vm52_vm0, %v2841_v29, %v2831_v41 }
 0x4bc   :  { %1597 = vmatprep.subr.bf16.mxu1 %v2654_v31  ;;  %v1528_v62 = vpop.permute.xlu1 %1527  ;;  %v1561_v63 = vsel %vm111_vm6, %v2896_v3, %v1532_v0 }
 0x4bd   :  { %1282 = vmatpush1.bf16.msra.mxu0 %v2558_v37  ;;  %v1225_v37 = vsel %vm52_vm0, %v2809_v57, %v2811_v8  ;;  %v1560_v2 = vsel %vm111_vm6, %v1528_v62, %v2896_v3 }
 0x4be   :  { %1283 = vmatprep.subr.bf16.mxu0 %v1227_v32 }
 0x4bf   :  { %1598 = vmatpush1.bf16.msra.mxu1 %v2644_v49  ;;  %v1206_v52 = vpop.permute.xlu0 %1205 }
 0x4c0   :  { %1599 = vmatprep.subr.bf16.mxu1 %v2579_v51  ;;  %v1208_v25 = vpop.permute.xlu1 %1207  ;;  %v1223_v51 = vsel %vm52_vm0, %v2831_v41, %v2836_v54  ;;  %v1242_v41 = vsel %vm52_vm0, %v1210_v53, %v1212_v44 }
 0x4c1   :  { %1284 = vmatpush1.bf16.msra.mxu0 %v1226_v17  ;;  %v1241_v54 = vsel %vm52_vm0, %v1206_v52, %v1208_v25 }
 0x4c2   :  { %1285 = vmatprep.subr.bf16.mxu0 %v1225_v37 }
 0x4c3   :  { %1600 = vmatpush1.bf16.msra.mxu1 %v2514_v50  ;;  %v1204_v49 = vpop.permute.xlu0 %1203  ;;  %v1543_v50 = vsel %vm111_vm6, %v2817_v36, %v2821_v7  ;;  %v1243_v36 = vsel %vm52_vm0, %v1212_v44, %v1214_v4 }
 0x4c4   :  { %1601 = vmatprep.subr.bf16.mxu1 %v1545_v48  ;;  %v1524_v20 = vpop.permute.xlu1 %1523  ;;  %v1240_v43 = vsel %vm52_vm0, %v1204_v49, %v1206_v52 }
 0x4c5   :  { %1286 = vmatpush1.bf16.msra.mxu0 %v1224_v16 }
 0x4c6   :  { %1287 = vmatprep.subr.bf16.mxu0 %v1223_v51 }
 0x4c7   :  { %1602 = vmatpush1.bf16.msra.mxu1 %v2804_v18  ;;  %v1526_v31 = vpop.permute.xlu0 %1525 }
 0x4c8   :  { %1603 = vmatprep.subr.bf16.mxu1 %v1543_v50  ;;  %v1220_v12 = vpop.permute.xlu1 %1219  ;;  %v1559_v47 = vsel %vm111_vm6, %v1524_v20, %v1526_v31 }
 0x4c9   :  { %1288 = vmatpush1.bf16.msra.mxu0 %v1222_v6 }
 0x4cb   :  { %1604 = vmatpush1.bf16.msra.mxu1 %v1542_v19  ;;  %v1218_v56 = vpop.permute.xlu0 %1217 }
 0x4cc   :  { %1605 = vmatprep.subr.bf16.mxu1 %v1541_v11  ;;  %v1244_v18 = vsel %vm52_vm0, %v2860_v60, %v1218_v56  ;;  %v1536_v57 = vpop.permute.xlu1 %1535  ;;  %v1245_v8 = vsel %vm52_vm0, %v1218_v56, %v1220_v12 }
 0x4cd   :  { %1297 = vmatprep.subr.bf16.mxu0 %v1245_v8  ;;  %v1562_v5 = vsel %vm111_vm6, %v2880_v35, %v1536_v57 }
 0x4ce   :  { %1298 = vmatpush2.bf16.msra.mxu0 %v1244_v18 }
 0x4cf   :  { %1606 = vmatpush1.bf16.msra.mxu1 %v1540_v27  ;;  %1299 = vmatprep.subr.bf16.mxu0 %v1243_v36  ;;  %v1538_v7 = vpop.permute.xlu0 %1537 }
 0x4d0   :  { %v1522_v26 = vpop.permute.xlu1 %1521  ;;  %v1563_v14 = vsel %vm111_vm6, %v1536_v57, %v1538_v7 }
 0x4d1   :  { %1615 = vmatprep.subr.bf16.mxu1 %v1563_v14  ;;  %v1558_v40 = vsel %vm111_vm6, %v1522_v26, %v1524_v20 }
 0x4d2   :  { %1300 = vmatpush2.bf16.msra.mxu0 %v1242_v41 }
 0x4d3   :  { %1616 = vmatpush2.bf16.msra.mxu1 %v1562_v5  ;;  %1301 = vmatprep.subr.bf16.mxu0 %v1241_v54  ;;  %v1200_v29 = vpop.permute.xlu0 %1199 }
 0x4d4   :  { %1617 = vmatprep.subr.bf16.mxu1 %v1561_v63  ;;  %v1202_v38 = vpop.permute.xlu1 %1201 }
 0x4d5   :  { %v1239_v9 = vsel %vm52_vm0, %v1200_v29, %v1202_v38 }
 0x4d6   :  { %1302 = vmatpush2.bf16.msra.mxu0 %v1240_v43 }
 0x4d7   :  { %1618 = vmatpush2.bf16.msra.mxu1 %v1560_v2  ;;  %1303 = vmatprep.subr.bf16.mxu0 %v1239_v9  ;;  %v1198_v61 = vpop.permute.xlu0 %1197 }
 0x4d8   :  { %1619 = vmatprep.subr.bf16.mxu1 %v1559_v47  ;;  %v1238_v34 = vsel %vm52_vm0, %v1198_v61, %v1200_v29  ;;  %v1518_v24 = vpop.permute.xlu1 %1517 }
 0x4da   :  { %1304 = vmatpush2.bf16.msra.mxu0 %v1238_v34 }
 0x4db   :  { %1620 = vmatpush2.bf16.msra.mxu1 %v1558_v40  ;;  %v1520_v60 = vpop.permute.xlu0 %1519 }
 0x4dc   :  { %v1516_v33 = vpop.permute.xlu1 %1515  ;;  %v1557_v39 = vsel %vm111_vm6, %v1518_v24, %v1520_v60 }
 0x4dd   :  { %v1556_v15 = vsel %vm111_vm6, %v1516_v33, %v1518_v24  ;;  %1306 = vmatmul.mubr.bf16.vlgmr.msra.gmra.mxu0 %v1855_v59  ;;  %1621 = vmatprep.subr.bf16.mxu1 %v1557_v39 }
 0x4df   :  { %1622 = vmatpush2.bf16.msra.mxu1 %v1556_v15 }
 0x4e2   :  { %1624 = vmatmul.mubr.bf16.vlgmr.msra.gmra.mxu1 %v1860_v10 }
 0x4e8   :  { %v1643_v58 = vpop.permute.xlu0 %1642 }
 0x4e9   :  { %v1648_v62 = vpop.permute.xlu1 %1647 }
 0x571   :  { %v1095_v45 = vpop.f32.mrf.mxu1 }
 0x573   :  { %v1097_v42 = vpop.f32.mrf.mxu1 }
 0x575   :  { %v1099_v22 = vpop.f32.mrf.mxu1 }
 0x577   :  { %v1101_v23 = vpop.f32.mrf.mxu1 }
 0x59d   :  { %v1307_v21 = vpop.f32.mrf.mxu0 }
 0x59e   :  { %v1308_v28 = vadd.f32 %v1307_v21, %v1095_v45 }
 0x59f   :  { %v1309_v13 = vpop.f32.mrf.mxu0 }
 0x5a0   :  { %v1310_v55 = vadd.f32 %v1309_v13, %v1097_v42 }
 0x5a1   :  { %v1311_v46 = vpop.f32.mrf.mxu0 }
 0x5a2   :  { %v1625_v35 = vpop.f32.mrf.mxu1  ;;  %v1312_v30 = vadd.f32 %v1311_v46, %v1099_v22 }
 0x5a3   :  { %v1634_v1 = vadd.f32 %v1625_v35, %v1308_v28  ;;  %v1313_v44 = vpop.f32.mrf.mxu0 }
 0x5a4   :  { %v1627_v4 = vpop.f32.mrf.mxu1  ;;  %v1314_v32 = vadd.f32 %v1313_v44, %v1101_v23 }
 0x5a5   :  { %v1635_v53 = vadd.f32 %v1627_v4, %v1310_v55  ;;  %v1650_v3 = vadd.f32 %v1643_v58, %v1634_v1 }
 0x5a6   :  { %v1629_v0 = vpop.f32.mrf.mxu1 }
 0x5a7   :  { %v1651_v52 = vadd.f32 %v1643_v58, %v1635_v53  ;;  %v1654_v17 = vmax.f32 %v1650_v3, 0.0  ;;  %v1636_v25 = vadd.f32 %v1629_v0, %v1312_v30 }
 0x5a8   :  { %v1631_v37 = vpop.f32.mrf.mxu1 }
 0x5a9   :  { %v1655_v48 = vmax.f32 %v1651_v52, 0.0  ;;  %1658 = vst [vmem:[%s2982_s4] sm:$0xff] %v1654_v17  ;;  %v1652_v49 = vadd.f32 %v1648_v62, %v1636_v25  ;;  %v1637_v16 = vadd.f32 %v1631_v37, %v1314_v32 }
 0x5ab   :  { %1659 = vst [vmem:[%s2982_s4 + $0x8] sm:$0xff] %v1655_v48  ;;  %v1656_v20 = vmax.f32 %v1652_v49, 0.0  ;;  %v1653_v51 = vadd.f32 %v1648_v62, %v1637_v16 }
 0x5ad   :  { %1660 = vst [vmem:[%s2982_s4 + $0x10] sm:$0x3] %v1656_v20  ;;  %v1657_v50 = vmax.f32 %v1653_v51, 0.0 }
 0x5af   :  { %1661 = vst [vmem:[%s2982_s4 + $0x18] sm:$0x3] %v1657_v50 }

</bundles_post_ra>
